<compile_context>
chip_gen: v7x
topology: tpu7x:2x2x1
jax: 0.10.0
libtpu: 0.0.40
codegen_flags: <defaults>
</compile_context>

<pallas_src>
import functools

import jax
import jax.numpy as jnp
import numpy as np
from jax.experimental import pallas as pl
from jax.experimental.pallas import tpu as pltpu


def _sigmoid(z):
    # sigmoid(z) == 0.5 * (1 + tanh(z / 2)): one EUP push per element instead of
    # exp + reciprocal.
    return 0.5 * jnp.tanh(0.5 * z) + 0.5


# ---------------------------------------------------------------------------
# Pallas kernel: full forward for ONE batch element (full L resident in VMEM).
# ---------------------------------------------------------------------------
def encoder_kernel(x_ref,       # (1, 4, L_pad + KM - 1)  zero-padded one-hot input (bf16)
                   w2_ref,      # (F, K_pad)  fused conv weights, bf16, column = 4*k + c
                   w1_ref,      # (F, F)      1x1 conv weights (bf16)
                   par_ref,     # (F, 8)      [bias, s1, t1, sa, ta, sm, tm, eca_taps] f32
                   out_ref,     # (1, F, L_pad)
                   slab_ref,    # VMEM (K_pad, L_pad) bf16: im2col staging
                   *, KM, CM, L_true):
    F = out_ref.shape[1]
    L_pad = out_ref.shape[2]
    n_groups = slab_ref.shape[0] // 16

    # ---- im2col directly in bf16: 4 taps (16 rows = one full sublane tile) per
    # store -> ~13 unmasked full-tile stores instead of ~51 masked 4-row stores.
    # Slab row order is 4*k + c; rows >= 4*KM are zeros (paired with zero w2 cols).
    xw = x_ref[0]                                        # (4, L_pad + KM - 1) bf16
    for g in range(n_groups):                            # static unroll
        parts = []
        for t in range(4):
            k = 4 * g + t
            if k < KM:
                parts.append(xw[:, k:k + L_pad])
            else:
                parts.append(jnp.zeros((4, L_pad), xw.dtype))
        slab_ref[16 * g:16 * (g + 1), :] = jnp.concatenate(parts, axis=0)

    # ---- fused motif + other conv (fwd + revcomp): ONE deep bf16 MXU matmul -----
    y = jnp.dot(w2_ref[...], slab_ref[...],
                preferred_element_type=jnp.float32)      # (F, L_pad) f32
    act = _sigmoid(y + par_ref[:, 0:1])                  # single sigmoid pass

    # ---- ECA channel attention on the motif rows (3-tap VPU form) ---------------
    motif = act[:CM, :]
    if L_true < L_pad:                                   # exclude padded cols (static)
        lane = jax.lax.broadcasted_iota(jnp.int32, (1, L_pad), 1)
        motif = motif * (lane < L_true).astype(jnp.float32)   # (1, L_pad) row bcast
    ch_mean = jnp.sum(motif, axis=-1, keepdims=True) * (1.0 / L_true)   # (CM, 1)
    z1 = jnp.zeros((1, 1), jnp.float32)
    m_prev = jnp.concatenate([z1, ch_mean[:-1, :]], axis=0)             # m[c-1]
    m_next = jnp.concatenate([ch_mean[1:, :], z1], axis=0)              # m[c+1]
    e0 = par_ref[0:1, 7:8]
    e1 = par_ref[1:2, 7:8]
    e2 = par_ref[2:3, 7:8]
    attn = _sigmoid(e0 * m_prev + e1 * ch_mean + e2 * m_next)           # (CM, 1)
    scale = jnp.concatenate([attn, jnp.ones((F - CM, 1), jnp.float32)], axis=0)
    feat_in = act * scale                                               # (F, L_pad)

    # ---- 1x1 conv (bf16 channel matmul, f32 acc) + folded BN + SiLU -------------
    pre = jnp.dot(w1_ref[...], feat_in.astype(w1_ref.dtype),
                  preferred_element_type=jnp.float32)
    pre = pre * par_ref[:, 1:2] + par_ref[:, 2:3]
    feature = pre * _sigmoid(pre)

    # ---- identity avg/max pool branches -> BN -> SiLU, residual add --------------
    a = feature * par_ref[:, 3:4] + par_ref[:, 4:5]
    a = a * _sigmoid(a)
    m = feature * par_ref[:, 5:6] + par_ref[:, 6:7]
    m = m * _sigmoid(m)

    out_ref[0] = (a + m + feature).astype(out_ref.dtype)


# ---------------------------------------------------------------------------
# Wrapper: parameter packing + pallas_call plumbing.
# ---------------------------------------------------------------------------
def encoder_forward(x, p, out_dtype=jnp.float32):
    # out_dtype=jnp.bfloat16 halves HBM writeback (worth it on v5e) if downstream
    # tolerates bf16.
    B, Cin, L = x.shape
    assert Cin == 4
    KM = p["w_motif"].shape[-1]
    KO = p["w_other"].shape[-1]
    assert KM % 2 == 1 and KO % 2 == 1 and KO <= KM
    PM = (KM - 1) // 2

    # Reverse-complement branch folded into extra output channels:
    #   conv(x.flip([1,2])).flip(2) == conv(x) with W[:, ::-1, ::-1]
    wm_full = jnp.concatenate([p["w_motif"], p["w_motif"][:, ::-1, ::-1]], axis=0)
    wo_full = jnp.concatenate([p["w_other"], p["w_other"][:, ::-1, ::-1]], axis=0)
    # Embed the KO-tap "other" conv centered in the KM-tap window (zero taps).
    dk = (KM - KO) // 2
    wo_emb = jnp.pad(wo_full, ((0, 0), (0, 0), (dk, KM - KO - dk)))
    w_fused = jnp.concatenate([wm_full, wo_emb], axis=0)        # (F, 4, KM)
    CM = wm_full.shape[0]
    F = w_fused.shape[0]

    # (F, 4*KM) with column index 4*k + c, padded to a multiple of 16 columns so
    # the im2col slab can be written in full (16, 128) bf16 tiles.
    K_pad = ((4 * KM + 15) // 16) * 16
    w2 = jnp.transpose(w_fused, (0, 2, 1)).reshape(F, KM * 4)
    w2 = jnp.pad(w2, ((0, 0), (0, K_pad - 4 * KM))).astype(jnp.bfloat16)

    b_full = jnp.concatenate(
        [p["b_motif"], p["b_motif"], p["b_other"], p["b_other"]]).astype(jnp.float32)

    def bn_fold(gamma, beta, mean, var, eps=1e-5):
        s = gamma / jnp.sqrt(var + eps)
        return s.astype(jnp.float32), (beta - mean * s).astype(jnp.float32)

    s1, t1 = bn_fold(*p["bn1"])
    sa, ta = bn_fold(*p["bna"])
    sm, tm = bn_fold(*p["bnm"])
    eca_col = jnp.zeros((F,), jnp.float32).at[:3].set(p["w_eca"].astype(jnp.float32))
    par = jnp.stack([b_full, s1, t1, sa, ta, sm, tm, eca_col], axis=1)   # (F, 8)

    # Lane-dense output: pad L up to a multiple of 128, slice back afterwards.
    L_pad = ((L + 127) // 128) * 128
    Lp = L_pad + KM - 1                                   # window incl. conv halo
    # bf16 input is exact for one-hot x and halves the input DMA.
    x_pad = jnp.pad(x.astype(jnp.bfloat16), ((0, 0), (0, 0), (PM, Lp - L - PM)))

    kernel = functools.partial(encoder_kernel, KM=KM, CM=CM, L_true=L)

    out = pl.pallas_call(
        kernel,
        out_shape=jax.ShapeDtypeStruct((B, F, L_pad), out_dtype),
        grid_spec=pltpu.PrefetchScalarGridSpec(
            num_scalar_prefetch=0,
            grid=(B,),
            in_specs=[
                pl.BlockSpec((1, 4, Lp), lambda b: (b, 0, 0)),
                pl.BlockSpec((F, K_pad), lambda b: (0, 0)),
                pl.BlockSpec((F, F), lambda b: (0, 0)),
                pl.BlockSpec((F, 8), lambda b: (0, 0)),
            ],
            out_specs=pl.BlockSpec((1, F, L_pad), lambda b: (b, 0, 0)),
            scratch_shapes=[
                pltpu.VMEM((K_pad, L_pad), jnp.bfloat16),
            ],
        ),
        # Footprint ~8 MB/step even at L=4650 -> comfortably inside v7x's 64 MiB.
        compiler_params=pltpu.CompilerParams(
            dimension_semantics=("parallel",),
            vmem_limit_bytes=32 * 1024 * 1024),
    )(x_pad, w2, p["w1"].astype(jnp.bfloat16), par)
    return out[:, :, :L]


# ---------------------------------------------------------------------------
# Pure-JAX reference (mirrors the PyTorch forward, incl. the explicit flips).
# ---------------------------------------------------------------------------
def encoder_reference(x, p):
    def conv1d(z, w, b, pad):
        y = jax.lax.conv_general_dilated(
            z, w, (1,), [(pad, pad)], dimension_numbers=("NCH", "OIH", "NCH"))
        return y + b[None, :, None]

    pm = (p["w_motif"].shape[-1] - 1) // 2
    po = (p["w_other"].shape[-1] - 1) // 2
    y_motif = jnp.concatenate(
        [conv1d(x, p["w_motif"], p["b_motif"], pm),
         jnp.flip(conv1d(jnp.flip(x, (1, 2)), p["w_motif"], p["b_motif"], pm), 2)],
        axis=1)
    y_other = jnp.concatenate(
        [conv1d(x, p["w_other"], p["b_other"], po),
         jnp.flip(conv1d(jnp.flip(x, (1, 2)), p["w_other"], p["b_other"], po), 2)],
        axis=1)

    motif_act = jax.nn.sigmoid(y_motif)
    mch = jnp.mean(motif_act, axis=-1)                               # (B, CM)
    mpad = jnp.pad(mch, ((0, 0), (1, 1)))
    we = p["w_eca"]
    attn = jax.nn.sigmoid(
        we[0] * mpad[:, :-2] + we[1] * mpad[:, 1:-1] + we[2] * mpad[:, 2:])
    motif_act = motif_act * attn[:, :, None]
    other_act = jax.nn.sigmoid(y_other)

    feat_in = jnp.concatenate([motif_act, other_act], axis=1)
    pre = jnp.einsum("oc,bcl->bol", p["w1"], feat_in)

    def bn_silu(z, bn):
        gamma, beta, mean, var = bn
        scale = gamma / jnp.sqrt(var + 1e-5)
        shift = beta - mean * scale
        z = z * scale[None, :, None] + shift[None, :, None]
        return jax.nn.silu(z)

    feature = bn_silu(pre, p["bn1"])
    oup = bn_silu(feature, p["bna"]) + bn_silu(feature, p["bnm"])
    return oup + feature


# ---------------------------------------------------------------------------
if __name__ == "__main__":
    B = 2
    N_MOTIFS, N_OTHERS = 27, 5
    KM, KO = 51, 3
    F = 2 * (N_MOTIFS + N_OTHERS)

    key = jax.random.PRNGKey(0)
    ks = jax.random.split(key, 20)

    params = {
        "w_motif": jax.random.normal(ks[0], (N_MOTIFS, 4, KM), jnp.float32) * 0.3,
        "b_motif": jax.random.normal(ks[1], (N_MOTIFS,), jnp.float32) * 0.1,
        "w_other": jax.random.normal(ks[2], (N_OTHERS, 4, KO), jnp.float32) * 0.3,
        "b_other": jax.random.normal(ks[3], (N_OTHERS,), jnp.float32) * 0.1,
        "w_eca": jax.random.normal(ks[4], (3,), jnp.float32) * 0.5,
        "w1": jax.random.normal(ks[5], (F, F), jnp.float32) * 0.1,
        "bn1": (1.0 + 0.1 * jax.random.normal(ks[6], (F,), jnp.float32),
                0.1 * jax.random.normal(ks[7], (F,), jnp.float32),
                0.1 * jax.random.normal(ks[8], (F,), jnp.float32),
                0.5 + jax.random.uniform(ks[9], (F,), jnp.float32)),
        "bna": (1.0 + 0.1 * jax.random.normal(ks[10], (F,), jnp.float32),
                0.1 * jax.random.normal(ks[11], (F,), jnp.float32),
                0.1 * jax.random.normal(ks[12], (F,), jnp.float32),
                0.5 + jax.random.uniform(ks[13], (F,), jnp.float32)),
        "bnm": (1.0 + 0.1 * jax.random.normal(ks[14], (F,), jnp.float32),
                0.1 * jax.random.normal(ks[15], (F,), jnp.float32),
                0.1 * jax.random.normal(ks[16], (F,), jnp.float32),
                0.5 + jax.random.uniform(ks[17], (F,), jnp.float32)),
    }

    # L=256 (lane-aligned) and L=300 (exercises the L % 128 != 0 masked-mean and
    # right-edge conv-halo path).  L stands in for 4650 (pools are identity).
    for L in (256, 300):
        base_idx = jax.random.randint(jax.random.fold_in(ks[18], L), (B, L), 0, 4)
        x = jnp.transpose(jax.nn.one_hot(base_idx, 4, dtype=jnp.float32), (0, 2, 1))

        out = jax.block_until_ready(encoder_forward(x, params))
        ref = jax.block_until_ready(encoder_reference(x, params))

        assert out.shape == (B, F, L), out.shape
        if not np.allclose(np.asarray(out), np.asarray(ref), rtol=1e-2, atol=1e-2):
            raise AssertionError(
                f"Pallas kernel output mismatch vs JAX reference (L={L})")

    print("KERNEL_OK")
</pallas_src>

<mosaic_0001>
module attributes {stable_mosaic.version = 11 : i64} {
  func.func @encoder_kernel(%arg0: i32, %arg1: memref<1x4x306xbf16, #tpu.memory_space<vmem>>, %arg2: memref<64x208xbf16, #tpu.memory_space<vmem>>, %arg3: memref<64x64xbf16, #tpu.memory_space<vmem>>, %arg4: memref<64x8xf32, #tpu.memory_space<vmem>>, %arg5: memref<1x64x256xf32, #tpu.memory_space<vmem>>, %arg6: memref<208x256xbf16, #tpu.memory_space<vmem>>) attributes {dimension_semantics = [#tpu.dimension_semantics<parallel>], iteration_bounds = array<i64: 2>, scalar_prefetch = 0 : i64, scratch_operands = 1 : i64, tpu.core_type = #tpu.core_type<tc>, window_params = [{transform_indices = @transform_0, window_bounds = array<i64: 1, 4, 306>}, {pipeline_mode = #tpu.pipeline_mode<synchronous>, transform_indices = @transform_1, window_bounds = array<i64: 64, 208>}, {pipeline_mode = #tpu.pipeline_mode<synchronous>, transform_indices = @transform_2, window_bounds = array<i64: 64, 64>}, {pipeline_mode = #tpu.pipeline_mode<synchronous>, transform_indices = @transform_3, window_bounds = array<i64: 64, 8>}, {transform_indices = @transform_4, window_bounds = array<i64: 1, 64, 256>}]} {
    %c0 = arith.constant 0 : index
    %c0_0 = arith.constant 0 : index
    %c0_1 = arith.constant 0 : index
    %0 = vector.load %arg1[%c0, %c0_0, %c0_1] : memref<1x4x306xbf16, #tpu.memory_space<vmem>>, vector<1x4x306xbf16>
    %1 = vector.shape_cast %0 : vector<1x4x306xbf16> to vector<4x306xbf16>
    %2 = vector.extract_strided_slice %1 {offsets = [0, 0], sizes = [4, 256], strides = [1, 1]} : vector<4x306xbf16> to vector<4x256xbf16>
    %3 = vector.extract_strided_slice %1 {offsets = [0, 1], sizes = [4, 256], strides = [1, 1]} : vector<4x306xbf16> to vector<4x256xbf16>
    %4 = vector.extract_strided_slice %1 {offsets = [0, 2], sizes = [4, 256], strides = [1, 1]} : vector<4x306xbf16> to vector<4x256xbf16>
    %5 = vector.extract_strided_slice %1 {offsets = [0, 3], sizes = [4, 256], strides = [1, 1]} : vector<4x306xbf16> to vector<4x256xbf16>
    %6 = tpu.concatenate %2, %3, %4, %5 in 0 : vector<4x256xbf16>, vector<4x256xbf16>, vector<4x256xbf16>, vector<4x256xbf16> -> vector<16x256xbf16>
    %c0_2 = arith.constant 0 : index
    %c0_3 = arith.constant 0 : index
    %7 = vector.load %arg6[%c0_2, %c0_3] : memref<208x256xbf16, #tpu.memory_space<vmem>>, vector<16x256xbf16>
    tpu.vector_store %arg6[%c0_2, %c0_3], %6 {strides = array<i32>} : memref<208x256xbf16, #tpu.memory_space<vmem>>, vector<16x256xbf16>,
    %8 = vector.extract_strided_slice %1 {offsets = [0, 4], sizes = [4, 256], strides = [1, 1]} : vector<4x306xbf16> to vector<4x256xbf16>
    %9 = vector.extract_strided_slice %1 {offsets = [0, 5], sizes = [4, 256], strides = [1, 1]} : vector<4x306xbf16> to vector<4x256xbf16>
    %10 = vector.extract_strided_slice %1 {offsets = [0, 6], sizes = [4, 256], strides = [1, 1]} : vector<4x306xbf16> to vector<4x256xbf16>
    %11 = vector.extract_strided_slice %1 {offsets = [0, 7], sizes = [4, 256], strides = [1, 1]} : vector<4x306xbf16> to vector<4x256xbf16>
    %12 = tpu.concatenate %8, %9, %10, %11 in 0 : vector<4x256xbf16>, vector<4x256xbf16>, vector<4x256xbf16>, vector<4x256xbf16> -> vector<16x256xbf16>
    %c16 = arith.constant 16 : index
    %c0_4 = arith.constant 0 : index
    %13 = vector.load %arg6[%c16, %c0_4] : memref<208x256xbf16, #tpu.memory_space<vmem>>, vector<16x256xbf16>
    tpu.vector_store %arg6[%c16, %c0_4], %12 {strides = array<i32>} : memref<208x256xbf16, #tpu.memory_space<vmem>>, vector<16x256xbf16>,
    %14 = vector.extract_strided_slice %1 {offsets = [0, 8], sizes = [4, 256], strides = [1, 1]} : vector<4x306xbf16> to vector<4x256xbf16>
    %15 = vector.extract_strided_slice %1 {offsets = [0, 9], sizes = [4, 256], strides = [1, 1]} : vector<4x306xbf16> to vector<4x256xbf16>
    %16 = vector.extract_strided_slice %1 {offsets = [0, 10], sizes = [4, 256], strides = [1, 1]} : vector<4x306xbf16> to vector<4x256xbf16>
    %17 = vector.extract_strided_slice %1 {offsets = [0, 11], sizes = [4, 256], strides = [1, 1]} : vector<4x306xbf16> to vector<4x256xbf16>
    %18 = tpu.concatenate %14, %15, %16, %17 in 0 : vector<4x256xbf16>, vector<4x256xbf16>, vector<4x256xbf16>, vector<4x256xbf16> -> vector<16x256xbf16>
    %c32 = arith.constant 32 : index
    %c0_5 = arith.constant 0 : index
    %19 = vector.load %arg6[%c32, %c0_5] : memref<208x256xbf16, #tpu.memory_space<vmem>>, vector<16x256xbf16>
    tpu.vector_store %arg6[%c32, %c0_5], %18 {strides = array<i32>} : memref<208x256xbf16, #tpu.memory_space<vmem>>, vector<16x256xbf16>,
    %20 = vector.extract_strided_slice %1 {offsets = [0, 12], sizes = [4, 256], strides = [1, 1]} : vector<4x306xbf16> to vector<4x256xbf16>
    %21 = vector.extract_strided_slice %1 {offsets = [0, 13], sizes = [4, 256], strides = [1, 1]} : vector<4x306xbf16> to vector<4x256xbf16>
    %22 = vector.extract_strided_slice %1 {offsets = [0, 14], sizes = [4, 256], strides = [1, 1]} : vector<4x306xbf16> to vector<4x256xbf16>
    %23 = vector.extract_strided_slice %1 {offsets = [0, 15], sizes = [4, 256], strides = [1, 1]} : vector<4x306xbf16> to vector<4x256xbf16>
    %24 = tpu.concatenate %20, %21, %22, %23 in 0 : vector<4x256xbf16>, vector<4x256xbf16>, vector<4x256xbf16>, vector<4x256xbf16> -> vector<16x256xbf16>
    %c48 = arith.constant 48 : index
    %c0_6 = arith.constant 0 : index
    %25 = vector.load %arg6[%c48, %c0_6] : memref<208x256xbf16, #tpu.memory_space<vmem>>, vector<16x256xbf16>
    tpu.vector_store %arg6[%c48, %c0_6], %24 {strides = array<i32>} : memref<208x256xbf16, #tpu.memory_space<vmem>>, vector<16x256xbf16>,
    %26 = vector.extract_strided_slice %1 {offsets = [0, 16], sizes = [4, 256], strides = [1, 1]} : vector<4x306xbf16> to vector<4x256xbf16>
    %27 = vector.extract_strided_slice %1 {offsets = [0, 17], sizes = [4, 256], strides = [1, 1]} : vector<4x306xbf16> to vector<4x256xbf16>
    %28 = vector.extract_strided_slice %1 {offsets = [0, 18], sizes = [4, 256], strides = [1, 1]} : vector<4x306xbf16> to vector<4x256xbf16>
    %29 = vector.extract_strided_slice %1 {offsets = [0, 19], sizes = [4, 256], strides = [1, 1]} : vector<4x306xbf16> to vector<4x256xbf16>
    %30 = tpu.concatenate %26, %27, %28, %29 in 0 : vector<4x256xbf16>, vector<4x256xbf16>, vector<4x256xbf16>, vector<4x256xbf16> -> vector<16x256xbf16>
    %c64 = arith.constant 64 : index
    %c0_7 = arith.constant 0 : index
    %31 = vector.load %arg6[%c64, %c0_7] : memref<208x256xbf16, #tpu.memory_space<vmem>>, vector<16x256xbf16>
    tpu.vector_store %arg6[%c64, %c0_7], %30 {strides = array<i32>} : memref<208x256xbf16, #tpu.memory_space<vmem>>, vector<16x256xbf16>,
    %32 = vector.extract_strided_slice %1 {offsets = [0, 20], sizes = [4, 256], strides = [1, 1]} : vector<4x306xbf16> to vector<4x256xbf16>
    %33 = vector.extract_strided_slice %1 {offsets = [0, 21], sizes = [4, 256], strides = [1, 1]} : vector<4x306xbf16> to vector<4x256xbf16>
    %34 = vector.extract_strided_slice %1 {offsets = [0, 22], sizes = [4, 256], strides = [1, 1]} : vector<4x306xbf16> to vector<4x256xbf16>
    %35 = vector.extract_strided_slice %1 {offsets = [0, 23], sizes = [4, 256], strides = [1, 1]} : vector<4x306xbf16> to vector<4x256xbf16>
    %36 = tpu.concatenate %32, %33, %34, %35 in 0 : vector<4x256xbf16>, vector<4x256xbf16>, vector<4x256xbf16>, vector<4x256xbf16> -> vector<16x256xbf16>
    %c80 = arith.constant 80 : index
    %c0_8 = arith.constant 0 : index
    %37 = vector.load %arg6[%c80, %c0_8] : memref<208x256xbf16, #tpu.memory_space<vmem>>, vector<16x256xbf16>
    tpu.vector_store %arg6[%c80, %c0_8], %36 {strides = array<i32>} : memref<208x256xbf16, #tpu.memory_space<vmem>>, vector<16x256xbf16>,
    %38 = vector.extract_strided_slice %1 {offsets = [0, 24], sizes = [4, 256], strides = [1, 1]} : vector<4x306xbf16> to vector<4x256xbf16>
    %39 = vector.extract_strided_slice %1 {offsets = [0, 25], sizes = [4, 256], strides = [1, 1]} : vector<4x306xbf16> to vector<4x256xbf16>
    %40 = vector.extract_strided_slice %1 {offsets = [0, 26], sizes = [4, 256], strides = [1, 1]} : vector<4x306xbf16> to vector<4x256xbf16>
    %41 = vector.extract_strided_slice %1 {offsets = [0, 27], sizes = [4, 256], strides = [1, 1]} : vector<4x306xbf16> to vector<4x256xbf16>
    %42 = tpu.concatenate %38, %39, %40, %41 in 0 : vector<4x256xbf16>, vector<4x256xbf16>, vector<4x256xbf16>, vector<4x256xbf16> -> vector<16x256xbf16>
    %c96 = arith.constant 96 : index
    %c0_9 = arith.constant 0 : index
    %43 = vector.load %arg6[%c96, %c0_9] : memref<208x256xbf16, #tpu.memory_space<vmem>>, vector<16x256xbf16>
    tpu.vector_store %arg6[%c96, %c0_9], %42 {strides = array<i32>} : memref<208x256xbf16, #tpu.memory_space<vmem>>, vector<16x256xbf16>,
    %44 = vector.extract_strided_slice %1 {offsets = [0, 28], sizes = [4, 256], strides = [1, 1]} : vector<4x306xbf16> to vector<4x256xbf16>
    %45 = vector.extract_strided_slice %1 {offsets = [0, 29], sizes = [4, 256], strides = [1, 1]} : vector<4x306xbf16> to vector<4x256xbf16>
    %46 = vector.extract_strided_slice %1 {offsets = [0, 30], sizes = [4, 256], strides = [1, 1]} : vector<4x306xbf16> to vector<4x256xbf16>
    %47 = vector.extract_strided_slice %1 {offsets = [0, 31], sizes = [4, 256], strides = [1, 1]} : vector<4x306xbf16> to vector<4x256xbf16>
    %48 = tpu.concatenate %44, %45, %46, %47 in 0 : vector<4x256xbf16>, vector<4x256xbf16>, vector<4x256xbf16>, vector<4x256xbf16> -> vector<16x256xbf16>
    %c112 = arith.constant 112 : index
    %c0_10 = arith.constant 0 : index
    %49 = vector.load %arg6[%c112, %c0_10] : memref<208x256xbf16, #tpu.memory_space<vmem>>, vector<16x256xbf16>
    tpu.vector_store %arg6[%c112, %c0_10], %48 {strides = array<i32>} : memref<208x256xbf16, #tpu.memory_space<vmem>>, vector<16x256xbf16>,
    %50 = vector.extract_strided_slice %1 {offsets = [0, 32], sizes = [4, 256], strides = [1, 1]} : vector<4x306xbf16> to vector<4x256xbf16>
    %51 = vector.extract_strided_slice %1 {offsets = [0, 33], sizes = [4, 256], strides = [1, 1]} : vector<4x306xbf16> to vector<4x256xbf16>
    %52 = vector.extract_strided_slice %1 {offsets = [0, 34], sizes = [4, 256], strides = [1, 1]} : vector<4x306xbf16> to vector<4x256xbf16>
    %53 = vector.extract_strided_slice %1 {offsets = [0, 35], sizes = [4, 256], strides = [1, 1]} : vector<4x306xbf16> to vector<4x256xbf16>
    %54 = tpu.concatenate %50, %51, %52, %53 in 0 : vector<4x256xbf16>, vector<4x256xbf16>, vector<4x256xbf16>, vector<4x256xbf16> -> vector<16x256xbf16>
    %c128 = arith.constant 128 : index
    %c0_11 = arith.constant 0 : index
    %55 = vector.load %arg6[%c128, %c0_11] : memref<208x256xbf16, #tpu.memory_space<vmem>>, vector<16x256xbf16>
    tpu.vector_store %arg6[%c128, %c0_11], %54 {strides = array<i32>} : memref<208x256xbf16, #tpu.memory_space<vmem>>, vector<16x256xbf16>,
    %56 = vector.extract_strided_slice %1 {offsets = [0, 36], sizes = [4, 256], strides = [1, 1]} : vector<4x306xbf16> to vector<4x256xbf16>
    %57 = vector.extract_strided_slice %1 {offsets = [0, 37], sizes = [4, 256], strides = [1, 1]} : vector<4x306xbf16> to vector<4x256xbf16>
    %58 = vector.extract_strided_slice %1 {offsets = [0, 38], sizes = [4, 256], strides = [1, 1]} : vector<4x306xbf16> to vector<4x256xbf16>
    %59 = vector.extract_strided_slice %1 {offsets = [0, 39], sizes = [4, 256], strides = [1, 1]} : vector<4x306xbf16> to vector<4x256xbf16>
    %60 = tpu.concatenate %56, %57, %58, %59 in 0 : vector<4x256xbf16>, vector<4x256xbf16>, vector<4x256xbf16>, vector<4x256xbf16> -> vector<16x256xbf16>
    %c144 = arith.constant 144 : index
    %c0_12 = arith.constant 0 : index
    %61 = vector.load %arg6[%c144, %c0_12] : memref<208x256xbf16, #tpu.memory_space<vmem>>, vector<16x256xbf16>
    tpu.vector_store %arg6[%c144, %c0_12], %60 {strides = array<i32>} : memref<208x256xbf16, #tpu.memory_space<vmem>>, vector<16x256xbf16>,
    %62 = vector.extract_strided_slice %1 {offsets = [0, 40], sizes = [4, 256], strides = [1, 1]} : vector<4x306xbf16> to vector<4x256xbf16>
    %63 = vector.extract_strided_slice %1 {offsets = [0, 41], sizes = [4, 256], strides = [1, 1]} : vector<4x306xbf16> to vector<4x256xbf16>
    %64 = vector.extract_strided_slice %1 {offsets = [0, 42], sizes = [4, 256], strides = [1, 1]} : vector<4x306xbf16> to vector<4x256xbf16>
    %65 = vector.extract_strided_slice %1 {offsets = [0, 43], sizes = [4, 256], strides = [1, 1]} : vector<4x306xbf16> to vector<4x256xbf16>
    %66 = tpu.concatenate %62, %63, %64, %65 in 0 : vector<4x256xbf16>, vector<4x256xbf16>, vector<4x256xbf16>, vector<4x256xbf16> -> vector<16x256xbf16>
    %c160 = arith.constant 160 : index
    %c0_13 = arith.constant 0 : index
    %67 = vector.load %arg6[%c160, %c0_13] : memref<208x256xbf16, #tpu.memory_space<vmem>>, vector<16x256xbf16>
    tpu.vector_store %arg6[%c160, %c0_13], %66 {strides = array<i32>} : memref<208x256xbf16, #tpu.memory_space<vmem>>, vector<16x256xbf16>,
    %68 = vector.extract_strided_slice %1 {offsets = [0, 44], sizes = [4, 256], strides = [1, 1]} : vector<4x306xbf16> to vector<4x256xbf16>
    %69 = vector.extract_strided_slice %1 {offsets = [0, 45], sizes = [4, 256], strides = [1, 1]} : vector<4x306xbf16> to vector<4x256xbf16>
    %70 = vector.extract_strided_slice %1 {offsets = [0, 46], sizes = [4, 256], strides = [1, 1]} : vector<4x306xbf16> to vector<4x256xbf16>
    %71 = vector.extract_strided_slice %1 {offsets = [0, 47], sizes = [4, 256], strides = [1, 1]} : vector<4x306xbf16> to vector<4x256xbf16>
    %72 = tpu.concatenate %68, %69, %70, %71 in 0 : vector<4x256xbf16>, vector<4x256xbf16>, vector<4x256xbf16>, vector<4x256xbf16> -> vector<16x256xbf16>
    %c176 = arith.constant 176 : index
    %c0_14 = arith.constant 0 : index
    %73 = vector.load %arg6[%c176, %c0_14] : memref<208x256xbf16, #tpu.memory_space<vmem>>, vector<16x256xbf16>
    tpu.vector_store %arg6[%c176, %c0_14], %72 {strides = array<i32>} : memref<208x256xbf16, #tpu.memory_space<vmem>>, vector<16x256xbf16>,
    %74 = vector.extract_strided_slice %1 {offsets = [0, 48], sizes = [4, 256], strides = [1, 1]} : vector<4x306xbf16> to vector<4x256xbf16>
    %75 = vector.extract_strided_slice %1 {offsets = [0, 49], sizes = [4, 256], strides = [1, 1]} : vector<4x306xbf16> to vector<4x256xbf16>
    %76 = vector.extract_strided_slice %1 {offsets = [0, 50], sizes = [4, 256], strides = [1, 1]} : vector<4x306xbf16> to vector<4x256xbf16>
    %cst = arith.constant 0.000000e+00 : bf16
    %77 = vector.broadcast %cst : bf16 to vector<4x256xbf16>
    %78 = tpu.concatenate %74, %75, %76, %77 in 0 : vector<4x256xbf16>, vector<4x256xbf16>, vector<4x256xbf16>, vector<4x256xbf16> -> vector<16x256xbf16>
    %c192 = arith.constant 192 : index
    %c0_15 = arith.constant 0 : index
    %79 = vector.load %arg6[%c192, %c0_15] : memref<208x256xbf16, #tpu.memory_space<vmem>>, vector<16x256xbf16>
    tpu.vector_store %arg6[%c192, %c0_15], %78 {strides = array<i32>} : memref<208x256xbf16, #tpu.memory_space<vmem>>, vector<16x256xbf16>,
    %c0_16 = arith.constant 0 : index
    %c0_17 = arith.constant 0 : index
    %80 = vector.load %arg2[%c0_16, %c0_17] : memref<64x208xbf16, #tpu.memory_space<vmem>>, vector<64x208xbf16>
    %c0_18 = arith.constant 0 : index
    %c0_19 = arith.constant 0 : index
    %81 = vector.load %arg6[%c0_18, %c0_19] : memref<208x256xbf16, #tpu.memory_space<vmem>>, vector<208x256xbf16>
    %cst_20 = arith.constant dense<0.000000e+00> : vector<64x256xf32>
    %82 = tpu.matmul %80, %81, %cst_20 {dimension_numbers = #tpu.dot_dimension_numbers<[1], [0], [0], [1], [0, 0, 1, 1], [], []>} : vector<64x208xbf16>, vector<208x256xbf16>, vector<64x256xf32> -> vector<64x256xf32>
    %c0_21 = arith.constant 0 : index
    %c0_22 = arith.constant 0 : index
    %83 = vector.load %arg4[%c0_21, %c0_22] : memref<64x8xf32, #tpu.memory_space<vmem>>, vector<64x1xf32>
    %84 = vector.broadcast %83 : vector<64x1xf32> to vector<64x256xf32>
    %85 = arith.addf %82, %84 : vector<64x256xf32>
    %cst_23 = arith.constant 5.000000e-01 : f32
    %86 = vector.broadcast %cst_23 : f32 to vector<64x256xf32>
    %87 = arith.mulf %86, %85 : vector<64x256xf32>
    %88 = math.tanh %87 : vector<64x256xf32>
    %cst_24 = arith.constant 5.000000e-01 : f32
    %89 = vector.broadcast %cst_24 : f32 to vector<64x256xf32>
    %90 = arith.mulf %89, %88 : vector<64x256xf32>
    %cst_25 = arith.constant 5.000000e-01 : f32
    %91 = vector.broadcast %cst_25 : f32 to vector<64x256xf32>
    %92 = arith.addf %90, %91 : vector<64x256xf32>
    %93 = vector.extract_strided_slice %92 {offsets = [0, 0], sizes = [54, 256], strides = [1, 1]} : vector<64x256xf32> to vector<54x256xf32>
    %cst_26 = arith.constant dense<0.000000e+00> : vector<54xf32>
    %94 = vector.multi_reduction <add>, %93, %cst_26 [1] : vector<54x256xf32> to vector<54xf32>
    %95 = vector.shape_cast %94 : vector<54xf32> to vector<54x1xf32>
    %cst_27 = arith.constant 3.906250e-03 : f32
    %96 = vector.broadcast %cst_27 : f32 to vector<54x1xf32>
    %97 = arith.mulf %95, %96 : vector<54x1xf32>
    %cst_28 = arith.constant 0.000000e+00 : f32
    %98 = vector.broadcast %cst_28 : f32 to vector<1x1xf32>
    %99 = vector.extract_strided_slice %97 {offsets = [0, 0], sizes = [53, 1], strides = [1, 1]} : vector<54x1xf32> to vector<53x1xf32>
    %100 = tpu.concatenate %98, %99 in 0 : vector<1x1xf32>, vector<53x1xf32> -> vector<54x1xf32>
    %101 = vector.extract_strided_slice %97 {offsets = [1, 0], sizes = [53, 1], strides = [1, 1]} : vector<54x1xf32> to vector<53x1xf32>
    %102 = tpu.concatenate %101, %98 in 0 : vector<53x1xf32>, vector<1x1xf32> -> vector<54x1xf32>
    %c0_29 = arith.constant 0 : index
    %c7 = arith.constant 7 : index
    %103 = vector.load %arg4[%c0_29, %c7] : memref<64x8xf32, #tpu.memory_space<vmem>>, vector<1x1xf32>
    %c1 = arith.constant 1 : index
    %c7_30 = arith.constant 7 : index
    %104 = vector.load %arg4[%c1, %c7_30] : memref<64x8xf32, #tpu.memory_space<vmem>>, vector<1x1xf32>
    %c2 = arith.constant 2 : index
    %c7_31 = arith.constant 7 : index
    %105 = vector.load %arg4[%c2, %c7_31] : memref<64x8xf32, #tpu.memory_space<vmem>>, vector<1x1xf32>
    %106 = vector.broadcast %103 : vector<1x1xf32> to vector<54x1xf32>
    %107 = arith.mulf %106, %100 : vector<54x1xf32>
    %108 = vector.broadcast %104 : vector<1x1xf32> to vector<54x1xf32>
    %109 = arith.mulf %108, %97 : vector<54x1xf32>
    %110 = arith.addf %107, %109 : vector<54x1xf32>
    %111 = vector.broadcast %105 : vector<1x1xf32> to vector<54x1xf32>
    %112 = arith.mulf %111, %102 : vector<54x1xf32>
    %113 = arith.addf %110, %112 : vector<54x1xf32>
    %cst_32 = arith.constant 5.000000e-01 : f32
    %114 = vector.broadcast %cst_32 : f32 to vector<54x1xf32>
    %115 = arith.mulf %114, %113 : vector<54x1xf32>
    %116 = math.tanh %115 : vector<54x1xf32>
    %cst_33 = arith.constant 5.000000e-01 : f32
    %117 = vector.broadcast %cst_33 : f32 to vector<54x1xf32>
    %118 = arith.mulf %117, %116 : vector<54x1xf32>
    %cst_34 = arith.constant 5.000000e-01 : f32
    %119 = vector.broadcast %cst_34 : f32 to vector<54x1xf32>
    %120 = arith.addf %118, %119 : vector<54x1xf32>
    %cst_35 = arith.constant 1.000000e+00 : f32
    %121 = vector.broadcast %cst_35 : f32 to vector<10x1xf32>
    %122 = tpu.concatenate %120, %121 in 0 : vector<54x1xf32>, vector<10x1xf32> -> vector<64x1xf32>
    %123 = vector.broadcast %122 : vector<64x1xf32> to vector<64x256xf32>
    %124 = arith.mulf %92, %123 : vector<64x256xf32>
    %c0_36 = arith.constant 0 : index
    %c0_37 = arith.constant 0 : index
    %125 = vector.load %arg3[%c0_36, %c0_37] : memref<64x64xbf16, #tpu.memory_space<vmem>>, vector<64x64xbf16>
    %126 = arith.truncf %124 : vector<64x256xf32> to vector<64x256xbf16>
    %cst_38 = arith.constant dense<0.000000e+00> : vector<64x256xf32>
    %127 = tpu.matmul %125, %126, %cst_38 {dimension_numbers = #tpu.dot_dimension_numbers<[1], [0], [0], [1], [0, 0, 1, 1], [], []>} : vector<64x64xbf16>, vector<64x256xbf16>, vector<64x256xf32> -> vector<64x256xf32>
    %c0_39 = arith.constant 0 : index
    %c1_40 = arith.constant 1 : index
    %128 = vector.load %arg4[%c0_39, %c1_40] : memref<64x8xf32, #tpu.memory_space<vmem>>, vector<64x1xf32>
    %129 = vector.broadcast %128 : vector<64x1xf32> to vector<64x256xf32>
    %130 = arith.mulf %127, %129 : vector<64x256xf32>
    %c0_41 = arith.constant 0 : index
    %c2_42 = arith.constant 2 : index
    %131 = vector.load %arg4[%c0_41, %c2_42] : memref<64x8xf32, #tpu.memory_space<vmem>>, vector<64x1xf32>
    %132 = vector.broadcast %131 : vector<64x1xf32> to vector<64x256xf32>
    %133 = arith.addf %130, %132 : vector<64x256xf32>
    %cst_43 = arith.constant 5.000000e-01 : f32
    %134 = vector.broadcast %cst_43 : f32 to vector<64x256xf32>
    %135 = arith.mulf %134, %133 : vector<64x256xf32>
    %136 = math.tanh %135 : vector<64x256xf32>
    %cst_44 = arith.constant 5.000000e-01 : f32
    %137 = vector.broadcast %cst_44 : f32 to vector<64x256xf32>
    %138 = arith.mulf %137, %136 : vector<64x256xf32>
    %cst_45 = arith.constant 5.000000e-01 : f32
    %139 = vector.broadcast %cst_45 : f32 to vector<64x256xf32>
    %140 = arith.addf %138, %139 : vector<64x256xf32>
    %141 = arith.mulf %133, %140 : vector<64x256xf32>
    %c0_46 = arith.constant 0 : index
    %c3 = arith.constant 3 : index
    %142 = vector.load %arg4[%c0_46, %c3] : memref<64x8xf32, #tpu.memory_space<vmem>>, vector<64x1xf32>
    %143 = vector.broadcast %142 : vector<64x1xf32> to vector<64x256xf32>
    %144 = arith.mulf %141, %143 : vector<64x256xf32>
    %c0_47 = arith.constant 0 : index
    %c4 = arith.constant 4 : index
    %145 = vector.load %arg4[%c0_47, %c4] : memref<64x8xf32, #tpu.memory_space<vmem>>, vector<64x1xf32>
    %146 = vector.broadcast %145 : vector<64x1xf32> to vector<64x256xf32>
    %147 = arith.addf %144, %146 : vector<64x256xf32>
    %cst_48 = arith.constant 5.000000e-01 : f32
    %148 = vector.broadcast %cst_48 : f32 to vector<64x256xf32>
    %149 = arith.mulf %148, %147 : vector<64x256xf32>
    %150 = math.tanh %149 : vector<64x256xf32>
    %cst_49 = arith.constant 5.000000e-01 : f32
    %151 = vector.broadcast %cst_49 : f32 to vector<64x256xf32>
    %152 = arith.mulf %151, %150 : vector<64x256xf32>
    %cst_50 = arith.constant 5.000000e-01 : f32
    %153 = vector.broadcast %cst_50 : f32 to vector<64x256xf32>
    %154 = arith.addf %152, %153 : vector<64x256xf32>
    %155 = arith.mulf %147, %154 : vector<64x256xf32>
    %c0_51 = arith.constant 0 : index
    %c5 = arith.constant 5 : index
    %156 = vector.load %arg4[%c0_51, %c5] : memref<64x8xf32, #tpu.memory_space<vmem>>, vector<64x1xf32>
    %157 = vector.broadcast %156 : vector<64x1xf32> to vector<64x256xf32>
    %158 = arith.mulf %141, %157 : vector<64x256xf32>
    %c0_52 = arith.constant 0 : index
    %c6 = arith.constant 6 : index
    %159 = vector.load %arg4[%c0_52, %c6] : memref<64x8xf32, #tpu.memory_space<vmem>>, vector<64x1xf32>
    %160 = vector.broadcast %159 : vector<64x1xf32> to vector<64x256xf32>
    %161 = arith.addf %158, %160 : vector<64x256xf32>
    %cst_53 = arith.constant 5.000000e-01 : f32
    %162 = vector.broadcast %cst_53 : f32 to vector<64x256xf32>
    %163 = arith.mulf %162, %161 : vector<64x256xf32>
    %164 = math.tanh %163 : vector<64x256xf32>
    %cst_54 = arith.constant 5.000000e-01 : f32
    %165 = vector.broadcast %cst_54 : f32 to vector<64x256xf32>
    %166 = arith.mulf %165, %164 : vector<64x256xf32>
    %cst_55 = arith.constant 5.000000e-01 : f32
    %167 = vector.broadcast %cst_55 : f32 to vector<64x256xf32>
    %168 = arith.addf %166, %167 : vector<64x256xf32>
    %169 = arith.mulf %161, %168 : vector<64x256xf32>
    %170 = arith.addf %155, %169 : vector<64x256xf32>
    %171 = arith.addf %170, %141 : vector<64x256xf32>
    %c0_56 = arith.constant 0 : index
    %c0_57 = arith.constant 0 : index
    %c0_58 = arith.constant 0 : index
    %172 = vector.load %arg5[%c0_56, %c0_57, %c0_58] : memref<1x64x256xf32, #tpu.memory_space<vmem>>, vector<1x64x256xf32>
    %173 = vector.shape_cast %172 : vector<1x64x256xf32> to vector<64x256xf32>
    %174 = vector.shape_cast %171 : vector<64x256xf32> to vector<1x64x256xf32>
    tpu.vector_store %arg5[%c0_56, %c0_57, %c0_58], %174 {strides = array<i32>} : memref<1x64x256xf32, #tpu.memory_space<vmem>>, vector<1x64x256xf32>,
    return
  }
  func.func @transform_0(%arg0: i32) -> (i32, i32, i32) {
    %c0_i32 = arith.constant 0 : i32
    %c0_i32_0 = arith.constant 0 : i32
    %c0_i32_1 = arith.constant 0 : i32
    return %arg0, %c0_i32, %c0_i32_0 : i32, i32, i32
  }
  func.func @transform_1(%arg0: i32) -> (i32, i32) {
    %c0_i32 = arith.constant 0 : i32
    %c0_i32_0 = arith.constant 0 : i32
    %c0_i32_1 = arith.constant 0 : i32
    return %c0_i32, %c0_i32_0 : i32, i32
  }
  func.func @transform_2(%arg0: i32) -> (i32, i32) {
    %c0_i32 = arith.constant 0 : i32
    %c0_i32_0 = arith.constant 0 : i32
    %c0_i32_1 = arith.constant 0 : i32
    return %c0_i32, %c0_i32_0 : i32, i32
  }
  func.func @transform_3(%arg0: i32) -> (i32, i32) {
    %c0_i32 = arith.constant 0 : i32
    %c0_i32_0 = arith.constant 0 : i32
    %c0_i32_1 = arith.constant 0 : i32
    return %c0_i32, %c0_i32_0 : i32, i32
  }
  func.func @transform_4(%arg0: i32) -> (i32, i32, i32) {
    %c0_i32 = arith.constant 0 : i32
    %c0_i32_0 = arith.constant 0 : i32
    %c0_i32_1 = arith.constant 0 : i32
    return %arg0, %c0_i32, %c0_i32_0 : i32, i32, i32
  }
}

</mosaic_0001>

<bundles_post_ra>
// kernel: tpu_custom_call.1
= control target key start
LH: loop header
LB: loop body
LE: loop exit
PB: predicated region body
PF: predicated region fallthrough
CT: control target
= control target key end

     0   :  { %9 = vsyncpa [#allocation4], 0  ;;  %s3235_s0 = inlined_call_operand.hbm [shape: bf16[2,4,306], index: 0, kind: input, shape index: {}]   ;;  %s3236_s1 = inlined_call_operand.vmem [shape: bf16[64,208], index: 1, kind: input, shape index: {}]   ;;  %s3237_s2 = inlined_call_operand.hbm [shape: bf16[64,64], index: 2, kind: input, shape index: {}]   ;;  %s3238_s3 = inlined_call_operand.vmem [shape: f32[64,8], index: 3, kind: input, shape index: {}]   ;;  %s3239_s4 = inlined_call_operand.hbm [shape: f32[2,64,256], index: 4, kind: output, shape index: {}]  }
   0x1   :  { %11 = vsyncpa [#allocation4 + $0x1], 0 }
   0x2   :  { %12 = vsyncpa [#allocation7], 0 }
   0x3   :  { %13 = vsyncpa [#allocation5], 0 }
   0x4   :  { %15 = vsyncpa [#allocation5 + $0x1], 0  ;;  %s2282_s15 = smov 0   ;;  %s2284_s16 = smov 0  }
   0x5   :  { %s2286_s17 = smov 0   ;;  %s2288_s18 = smov 0  }
   0x6 LB: > { %s2303_s19 = sadd.s32 4294967295, %s2223_s18   ;;  %s1793_s20 = sadd.s32 4294967294, %s2223_s18   ;;  %s2223_s18 = sphi %s2288_s18, %s3262_s18   ;;  %s2219_s17 = sphi %s2286_s17, %s3261_s17   ;;  %s2215_s16 = sphi %s2284_s16, %s3260_s16   ;;  %s2211_s15 = sphi %s2282_s15, %s3259_s15  }
   0x7   : > { %p41_p0 = scmp.ne.s32.totalorder %s2215_s16, %s2211_s15  ;;  %p3240_p1 = scmp.eq.s32.totalorder %s2303_s19, 0 }
   0x8   : > { %p134_p3 = scmp.eq.s32.totalorder %s1793_s20, 1  ;;  %p1794_p5 = scmp.ge.s32.totalorder %s2223_s18, 1 }
   0x9   : > { %p2312_p4 = por %p3240_p1, %p41_p0  ;;  %p141_p7 = scmp.lt.s32.totalorder %s2223_s18, 3 }
   0xa   : > { %p2317_p6 = por %p134_p3, %p41_p0  ;;  %s2225_s24 = smov [#allocation6]  }
   0xb   : > { %s3244_s21 = scalar_select %p2312_p4, 1, 0 }
   0xc   : > { %s3245_s22 = scalar_select %p2317_p6, 1, 0 }
   0xd   : > { %p2322_p8 = pnand %p1794_p5, %p141_p7  ;;  %s156_s25 = sshll.u32 %s2225_s24, 4  ;;  %s2326_s25 = int_to_ptr.vmem [resolvable:$true] %s156_s25 }
   0xe   : > { %s2338_s27 = sadd.s32 1, %s2223_s18   ;;  %s28_s28 = sadd.s32 1, %s2219_s17 }
   0xf   : > { %s3246_s23 = scalar_select %p2322_p8, 1, 0 }
  0x10   : > { %p1841_p9 = pneg %p2322_p8  ;;  %s25_s29 = ssub.s32 %s2223_s18, %s2338_s27 }
  0x11   : > { %s2095_s6 = scalar_lea.hbm %s3237_s2, 512 }
  0x12   : > { %p2333_p11 = pnand %p1841_p9, %p3240_p1  ;;  %p2096_p12 = scmp.ne.s32.totalorder %s3237_s2, %s2095_s6 }
  0x13   : > { %p2102_p5 = scmp.lt.u32.totalorder %s2095_s6, %s3237_s2 }
  0x14   : > { %p2097_p13 = pneg %p2333_p11 }
  0x16   : > { %p2098_p0 = pnand %p2097_p13, %p2096_p12 }
  0x18   : > { %p2099_p3 = pneg %p2098_p0 }
  0x1a   : > { %p2104_p7 = pnand %p2102_p5, %p2099_p3 }
  0x1c   : > { %2107 = shalt.err (!%p2104_p7)
}
  0x1d   : > { %s2108_s11 = scalar_lea.vmem %s2326_s25, 512  ;;  %p2116_p2 = scmp.lt.s32.totalorder %s2326_s25, %s2326_s25 }
  0x1e   : > { %p2109_p9 = scmp.ne.s32.totalorder %s2326_s25, %s2108_s11  ;;  %p2117_p6 = scmp.lt.s32.totalorder %s2108_s11, %s2108_s11 }
  0x20   : > { %p2111_p10 = pnand %p2109_p9, %p2097_p13  ;;  %p2118_p4 = por %p2117_p6, %p2116_p2 }
  0x22   : > { %p2112_p1 = pneg %p2111_p10 }
  0x24   : > { %p2119_p8 = pnand %p2118_p4, %p2112_p1 }
  0x26   : > { %2122 = shalt.err (!%p2119_p8)
}
  0x27   : > { %s2226_s12 = smov 64   ;;  %s2227_s13 = smov 4  }
  0x28   : > { %1844 = dma.hbm_to_vmem [thread:$0]  (!%p2333_p11), %s3237_s2, 512, %s2326_s25, [#allocation7], %s2226_s12, %s2226_s12, %s2227_s13  }
  0x29   : > { %p26_p2 = scmp.eq.s32.totalorder %s25_s29, 0  ;;  %p35_p1 = scmp.ne.s32.totalorder %s2219_s17, %s2215_s16 }
  0x2a   : > { %p36_p4 = scmp.eq.s32.totalorder %s2223_s18, 0  ;;  %p1854_p6 = scmp.lt.s32.totalorder %s2223_s18, 2 }
  0x2b   : > { %s2369_s24 = scalar_select %p26_p2, %s2219_s17, %s28_s28  }
  0x2c   : > { %p37_p8 = por %p36_p4, %p35_p1  ;;  %p3248_p10 = scmp.eq.s32.totalorder %s2303_s19, 1 }
  0x2d   : > { %s173_s5 = sand.u32 1, %s2219_s17   ;;  %s1831_s6 = smul.u32 96, %s2223_s18 }
  0x2e   : > { %p2373_p12 = por %p3248_p10, %p35_p1  ;;  %s1830_s7 = smul.u32 6, %s173_s5 }
  0x2f   : > { %p2379_p13 = pnand %p1854_p6, %p37_p8  ;;  %s2386_s28 = scalar_lea.hbm %s3235_s0, %s1831_s6 }
  0x30   : > { %s177_s8 = scalar_lea.vmem [#allocation3], %s1830_s7  ;;  %s174_s10 = scalar_lea.sflag [#allocation4], %s173_s5 }
  0x31   : > { %s185_s9 = sshll.u32 %s177_s8, 4  ;;  %s2123_s11 = scalar_lea.hbm %s2386_s28, 96  ;;  %s2388_s9 = int_to_ptr.vmem [resolvable:$true] %s185_s9 }
  0x32   : > { %p2124_p11 = scmp.ne.s32.totalorder %s2386_s28, %s2123_s11  ;;  %p2125_p0 = pneg %p2379_p13 }
  0x33   : > { %s2128_s14 = scalar_lea.hbm %s3235_s0, 192  ;;  %p2129_p7 = scmp.lt.u32.totalorder %s2386_s28, %s3235_s0 }
  0x34   : > { %p2126_p3 = pnand %p2125_p0, %p2124_p11  ;;  %p2130_p9 = scmp.lt.u32.totalorder %s2128_s14, %s2123_s11 }
  0x35   : > { %p2132_p1 = scmp.lt.u32.totalorder %s2123_s11, %s2386_s28 }
  0x36   : > { %p2127_p5 = pneg %p2126_p3  ;;  %p2131_p2 = por %p2130_p9, %p2129_p7 }
  0x38   : > { %p2133_p4 = por %p2132_p1, %p2131_p2 }
  0x3a   : > { %p2134_p6 = pnand %p2133_p4, %p2127_p5 }
  0x3c   : > { %2137 = shalt.err (!%p2134_p6)
}
  0x3d   : > { %s2138_s5 = scalar_lea.vmem %s2388_s9, 96  ;;  %s2228_s7 = smov [#allocation3]  }
  0x3e   : > { %p2139_p8 = scmp.ne.s32.totalorder %s2388_s9, %s2138_s5  ;;  %s2143_s25 = sshll.u32 %s2228_s7, 4  ;;  %s2144_s25 = int_to_ptr.vmem [resolvable:$false] %s2143_s25 }
  0x3f   : > { %s2145_s29 = scalar_lea.vmem %s2144_s25, 192  ;;  %p2146_p3 = scmp.lt.s32.totalorder %s2388_s9, %s2144_s25 }
  0x40   : > { %p2141_p10 = pnand %p2139_p8, %p2125_p0  ;;  %p2147_p7 = scmp.lt.s32.totalorder %s2145_s29, %s2138_s5 }
  0x42   : > { %p2142_p11 = pneg %p2141_p10  ;;  %p2148_p9 = por %p2147_p7, %p2146_p3 }
  0x44   : > { %p2149_p2 = pnand %p2148_p9, %p2142_p11 }
  0x46   : > { %2152 = shalt.err (!%p2149_p2)
}
  0x47   : > { %1848 = dma.hbm_to_vmem [thread:$0]  (!%p2379_p13), %s2386_s28, 96, %s2388_s9, %s174_s10  }
  0x48   : > { %p3251_p5 = scmp.ne.s32.totalorder %s3246_s23, 0 }
  0x4a   : > { %194 = sbr.rel (%p3251_p5) target bundleno = 1440 (0x5a0), region = 36 }
  0x51   : > { %s2418_s8 = sand.u32 1, %s2215_s16   ;;  %p3252_p0 = scmp.ne.s32.totalorder %s3244_s21, 0 }
  0x52   : > { %s1832_s11 = smul.u32 6, %s2418_s8  ;;  %s197_s12 = scalar_lea.sflag [#allocation4], %s2418_s8 }
  0x54   : > { %s200_s13 = scalar_lea.vmem [#allocation3], %s1832_s11 }
  0x55   : > { %2198 = dma.done.wait (%p3252_p0), %s197_s12, 96  }
  0x56   : > { %2200 = vsyncadd (%p3252_p0), %s197_s12, 4294967200  ;;  %p3253_p1 = scmp.eq.s32.totalorder %s2303_s19, 0 }
  0x58   : > { %2202 = dma.done.wait (%p3253_p1), [#allocation7], 512   ;;  %p3254_p13 = pmov %p3253_p1 }
  0x59   : > { %v235_v0 = vlaneseq  ;;  %v2229_v1 = vmov 1983009808   ;;  %v230_v6 = vld [vmem:[%s200_s13] sm:$0x3f]  ;;  %s2230_s23 = smov 126   ;;  %s2231_s26 = smov 127  }
  0x5a   : > { %2204 = vsyncadd (%p3254_p13), [#allocation7], 4294966784  ;;  %v233_v2 = vunpack.c.l.s4 %v2229_v1  ;;  %v240_v8 = vcombine.low %v230_v6, %v230_v6  ;;  %v258_v10 = vcombine.high %v230_v6, %v230_v6  ;;  %s2232_s21 = smov 125   ;;  %vm255_vm0 = vcmask 1039360   ;;  %s2233_s28 = smov 120   ;;  %v2455_v45 = vld [vmem:[%s3238_s3] sm:$0xff] }
  0x5b   : > { %v236_v3 = vshrl.u32 %v235_v0, 7  ;;  %vm287_vm1 = vcmask 1041408   ;;  %vm284_vm2 = vcmask 1022976   ;;  %vm274_vm3 = vcmask 1031168   ;;  %s2234_s9 = smov 124   ;;  %s2235_s10 = smov 112  }
  0x5c   : > { %v234_v4 = vunpack.c.0.s8 %v233_v2  ;;  %vm294_vm4 = vcmask 1043456   ;;  %vm299_vm5 = vcmask 1045504   ;;  %s2236_s14 = smov 116   ;;  %s2237_s20 = smov 104   ;;  %v1939_v41 = vld [vmem:[%s3236_s1 + $0x4] ss:$8 sps:$4 sm:$0xff]  }
  0x5d   : > { %s2238_s6 = smov 108   ;;  %s2239_s5 = smov 96   ;;  %vm474_vm6 = vcmask 654336   ;;  %v2460_v46 = vld [vmem:[%s3238_s3 + $0x8] sm:$0xff]  ;;  %v2245_v47 = vmov 0   ;;  %v2469_v48 = vld [vmem:[%s3238_s3 + $0x10] sm:$0xff] }
  0x5e   : > { %v237_v5 = vsub.s32 %v234_v4, %v236_v3  ;;  %s2240_s7 = smov 100   ;;  %s2241_s25 = smov 88   ;;  %1809 = vmatprep.mubr.msk.bf16.mxu0 %vm474_vm6, %v1939_v41  ;;  %1919 = vset.pattern.permute.xlu1 %v2245_v47  ;;  %v2474_v49 = vld [vmem:[%s3238_s3 + $0x20] sm:$0xff]  ;;  %v2482_v50 = vld [vmem:[%s3238_s3 + $0x18] sm:$0xff]  ;;  %v2487_v51 = vld [vmem:[%s3238_s3 + $0x30] sm:$0xff]  ;;  %vm324_vm7 = vcmask 1014784  }
  0x5f   : > { %s2242_s29 = smov 92   ;;  %s2243_s11 = smov 84   ;;  %1920 = vset.pattern.permute.xlu0 %v2245_v47  ;;  %1079 = vmatprep.mubr.bf16.mxu1 %v2245_v47  ;;  %v2494_v52 = vld [vmem:[%s3238_s3 + $0x28] sm:$0xff]  ;;  %vm337_vm8 = vcmask 982016   ;;  %vm350_vm9 = vcmask 949248   ;;  %vm363_vm10 = vcmask 916480  }
  0x60   : > { %v238_v7 = vrot.slane %v230_v6, %v237_v5  ;;  %v247_v9 = vrot.slane %v240_v8, %v237_v5  ;;  %v265_v13 = vrot.slane %v258_v10, %v237_v5  ;;  %vm376_vm11 = vcmask 883712   ;;  %s2254_s12 = smov [#allocation8]  }
  0x61   : > { %vm389_vm12 = vcmask 850944   ;;  %vm402_vm13 = vcmask 818176   ;;  %vm415_vm14 = vcmask 785408   ;;  %vm428_vm15 = vcmask 752640   ;;  %s2157_s13 = sshll.u32 %s2254_s12, 4  ;;  %s2158_s13 = int_to_ptr.vmem [resolvable:$false] %s2157_s13 }
  0x62   : > { %270 = vrot.lane.b32.xlu1 %v238_v7, %s2230_s23  ;;  %253 = vrot.lane.b32.xlu0 %v238_v7, %s2231_s26  ;;  %v248_v11 = vcombine.high %v247_v9, %v247_v9  ;;  %v266_v12 = vcombine.low %v238_v7, %v238_v7  ;;  %v267_v14 = vcombine.low %v265_v13, %v265_v13 }
  0x63   : > { %v277_v15 = vcombine.low %v247_v9, %v247_v9  ;;  %v239_v22 = vcombine.high %v238_v7, %v238_v7 }
  0x66   : > { %249 = vrot.lane.b32.xlu1 %v247_v9, %s2231_s26  ;;  %280 = vrot.lane.b32.xlu0 %v247_v9, %s2232_s21 }
  0x6a   : > { %251 = vrot.lane.b32.xlu0 %v248_v11, %s2231_s26  ;;  %268 = vrot.lane.b32.xlu1 %v266_v12, %s2230_s23 }
  0x6e   : > { %272 = vrot.lane.b32.xlu0 %v267_v14, %s2230_s23  ;;  %282 = vrot.lane.b32.xlu1 %v266_v12, %s2232_s21  ;;  %s2244_s23 = smov 80  }
  0x72   : > { %278 = vrot.lane.b32.xlu0 %v277_v15, %s2232_s21 }
  0xd4   : > { %v271_v16 = vpop.permute.xlu1 %270  ;;  %v254_v17 = vpop.permute.xlu0 %253 }
  0xd5   : > { %v310_v25 = vsel %vm287_vm1, %v265_v13, %v254_v17 }
  0xd8   : > { %v250_v18 = vpop.permute.xlu1 %249  ;;  %v281_v19 = vpop.permute.xlu0 %280 }
  0xdc   : > { %v252_v20 = vpop.permute.xlu0 %251  ;;  %v269_v21 = vpop.permute.xlu1 %268 }
  0xdd   : > { %v257_v23 = vsel %vm255_vm0, %v252_v20, %v254_v17  ;;  %v256_v24 = vsel %vm255_vm0, %v250_v18, %v252_v20  ;;  %v275_v33 = vsel %vm274_vm3, %v269_v21, %v271_v16  ;;  %vm441_vm0 = vcmask 719872  }
  0xde   : > { %v293_v28 = vsel %vm287_vm1, %v239_v22, %v257_v23  ;;  %v290_v32 = vsel %vm287_vm1, %v238_v7, %v256_v24  ;;  %vm454_vm1 = vcmask 687104  }
  0xdf   : > { %v296_v38 = vsel %vm294_vm4, %v290_v32, %v275_v33 }
  0xe0   : > { %v273_v26 = vpop.permute.xlu0 %272  ;;  %v283_v27 = vpop.permute.xlu1 %282  ;;  %v462_v43 = vsel %vm299_vm5, %v296_v38, 0 }
  0xe1   : > { %v276_v29 = vsel %vm274_vm3, %v271_v16, %v273_v26  ;;  %v2431_v30 = vsel %vm294_vm4, %v310_v25, %v273_v26  ;;  %v286_v31 = vsel %vm284_vm2, %v281_v19, %v283_v27  ;;  %vm802_vm3 = vcmask 1046528  }
  0xe2   : > { %v298_v34 = vsel %vm294_vm4, %v293_v28, %v276_v29  ;;  %v314_v35 = vsel %vm299_vm5, %v2431_v30, %v283_v27  ;;  %v464_v44 = vsel %vm299_vm5, %v2431_v30, 0  ;;  %vm817_vm4 = vcmask 1044480  }
  0xe3   : > { %v304_v36 = vsel %vm299_vm5, %v298_v34, %v286_v31  ;;  %335 = vrot.lane.b32.xlu1 %v314_v35, %s2233_s28  ;;  %322 = vrot.lane.b32.xlu0 %v314_v35, %s2234_s9  ;;  %v463_v42 = vsel %vm299_vm5, %v298_v34, 0 }
  0xe4   : > { %v279_v37 = vpop.permute.xlu0 %278  ;;  %612 = vmatprep.subr.bf16.mxu0 %v304_v36 }
  0xe5   : > { %v285_v39 = vsel %vm284_vm2, %v279_v37, %v281_v19  ;;  %vm786_vm2 = vcmask 1040384  }
  0xe6   : > { %v301_v40 = vsel %vm299_vm5, %v296_v38, %v285_v39 }
  0xe7   : > { %361 = vrot.lane.b32.xlu1 %v314_v35, %s2235_s10  ;;  %348 = vrot.lane.b32.xlu0 %v314_v35, %s2236_s14 }
  0xe8   : > { %613 = vmatpush1.bf16.msra.mxu0 %v301_v40 }
  0xeb   : > { %387 = vrot.lane.b32.xlu1 %v314_v35, %s2237_s20  ;;  %374 = vrot.lane.b32.xlu0 %v314_v35, %s2238_s6 }
  0xef   : > { %413 = vrot.lane.b32.xlu1 %v314_v35, %s2239_s5  ;;  %400 = vrot.lane.b32.xlu0 %v314_v35, %s2240_s7 }
  0xf3   : > { %439 = vrot.lane.b32.xlu1 %v314_v35, %s2241_s25  ;;  %426 = vrot.lane.b32.xlu0 %v314_v35, %s2242_s29 }
  0xf7   : > { %452 = vrot.lane.b32.xlu0 %v314_v35, %s2243_s11  ;;  %320 = vrot.lane.b32.xlu1 %v304_v36, %s2234_s9 }
  0xfb   : > { %333 = vrot.lane.b32.xlu0 %v304_v36, %s2233_s28  ;;  %318 = vrot.lane.b32.xlu1 %v301_v40, %s2234_s9 }
  0xff   : > { %331 = vrot.lane.b32.xlu0 %v301_v40, %s2233_s28  ;;  %346 = vrot.lane.b32.xlu1 %v304_v36, %s2236_s14 }
 0x103   : > { %359 = vrot.lane.b32.xlu0 %v304_v36, %s2235_s10  ;;  %344 = vrot.lane.b32.xlu1 %v301_v40, %s2236_s14  ;;  %s1800_s14 = sshll.u32 %s2418_s8, 7 }
 0x107   : > { %357 = vrot.lane.b32.xlu0 %v301_v40, %s2235_s10  ;;  %372 = vrot.lane.b32.xlu1 %v304_v36, %s2238_s6 }
 0x10b   : > { %385 = vrot.lane.b32.xlu0 %v304_v36, %s2237_s20  ;;  %370 = vrot.lane.b32.xlu1 %v301_v40, %s2238_s6  ;;  %s1829_s6 = sshll.u32 %s2303_s19, 11  ;;  %s1697_s19 = scalar_lea.sflag [#allocation5], %s2418_s8 }
 0x10f   : > { %383 = vrot.lane.b32.xlu0 %v301_v40, %s2237_s20  ;;  %398 = vrot.lane.b32.xlu1 %v304_v36, %s2240_s7  ;;  %s3009_s20 = scalar_lea.vmem [#allocation8], %s1800_s14 }
 0x113   : > { %411 = vrot.lane.b32.xlu0 %v304_v36, %s2239_s5  ;;  %396 = vrot.lane.b32.xlu1 %v301_v40, %s2240_s7 }
 0x117   : > { %409 = vrot.lane.b32.xlu0 %v301_v40, %s2239_s5  ;;  %424 = vrot.lane.b32.xlu1 %v304_v36, %s2242_s29  ;;  %s1710_s5 = sshll.u32 %s3009_s20, 4  ;;  %s3188_s5 = int_to_ptr.vmem [resolvable:$true] %s1710_s5 }
 0x118   : > { %p2160_p10 = scmp.lt.s32.totalorder %s3188_s5, %s2158_s13 }
 0x11b   : > { %437 = vrot.lane.b32.xlu0 %v304_v36, %s2241_s25  ;;  %422 = vrot.lane.b32.xlu1 %v301_v40, %s2242_s29  ;;  %s3186_s29 = scalar_lea.hbm %s3239_s4, %s1829_s6 }
 0x11f   : > { %435 = vrot.lane.b32.xlu0 %v301_v40, %s2241_s25  ;;  %450 = vrot.lane.b32.xlu1 %v304_v36, %s2243_s11 }
 0x123   : > { %470 = vrot.lane.b32.xlu0 %v463_v42, %s2244_s23  ;;  %448 = vrot.lane.b32.xlu1 %v301_v40, %s2243_s11  ;;  %s2246_s11 = smov 7  }
 0x127   : > { %468 = vrot.lane.b32.xlu0 %v462_v43, %s2244_s23  ;;  %472 = vrot.lane.b32.xlu1 %v464_v44, %s2244_s23  ;;  %s2159_s23 = scalar_lea.vmem %s2158_s13, 4096 }
 0x12b   : > { %525 = vperm.xlu1 %1919, %v2455_v45   ;;  %530 = vperm.xlu0 %1920, %v2460_v46  }
 0x12f   : > { %535 = vperm.xlu1 %1919, %v2469_v48   ;;  %545 = vperm.xlu0 %1920, %v2474_v49  }
 0x133   : > { %540 = vperm.xlu1 %1919, %v2482_v50   ;;  %555 = vperm.xlu0 %1920, %v2487_v51  }
 0x137   : > { %550 = vperm.xlu1 %1919, %v2494_v52  }
 0x155   : > { %v336_v53 = vpop.permute.xlu1 %335  ;;  %v323_v54 = vpop.permute.xlu0 %322 }
 0x159   : > { %v362_v55 = vpop.permute.xlu1 %361  ;;  %v349_v56 = vpop.permute.xlu0 %348 }
 0x15d   : > { %v388_v57 = vpop.permute.xlu1 %387  ;;  %v375_v58 = vpop.permute.xlu0 %374 }
 0x161   : > { %v414_v59 = vpop.permute.xlu1 %413  ;;  %v401_v60 = vpop.permute.xlu0 %400 }
 0x165   : > { %v2497_v61 = vpop.permute.xlu1 %439  ;;  %v427_v62 = vpop.permute.xlu0 %426 }
 0x169   : > { %v2499_v63 = vpop.permute.xlu0 %452  ;;  %v321_v0 = vpop.permute.xlu1 %320 }
 0x16a   : > { %v326_v1 = vsel %vm324_vm7, %v321_v0, %v323_v54 }
 0x16b   : > { %614 = vmatprep.subr.bf16.mxu0 %v326_v1 }
 0x16d   : > { %v334_v2 = vpop.permute.xlu0 %333  ;;  %v319_v3 = vpop.permute.xlu1 %318 }
 0x16e   : > { %v325_v4 = vsel %vm324_vm7, %v319_v3, %v321_v0  ;;  %v339_v5 = vsel %vm337_vm8, %v334_v2, %v336_v53 }
 0x16f   : > { %615 = vmatpush1.bf16.msra.mxu0 %v325_v4 }
 0x170   : > { %616 = vmatprep.subr.bf16.mxu0 %v339_v5 }
 0x171   : > { %v332_v6 = vpop.permute.xlu0 %331  ;;  %v347_v7 = vpop.permute.xlu1 %346 }
 0x172   : > { %v338_v8 = vsel %vm337_vm8, %v332_v6, %v334_v2  ;;  %v352_v9 = vsel %vm350_vm9, %v347_v7, %v349_v56 }
 0x173   : > { %617 = vmatpush1.bf16.msra.mxu0 %v338_v8 }
 0x174   : > { %618 = vmatprep.subr.bf16.mxu0 %v352_v9 }
 0x175   : > { %v360_v10 = vpop.permute.xlu0 %359  ;;  %v345_v11 = vpop.permute.xlu1 %344 }
 0x176   : > { %v351_v12 = vsel %vm350_vm9, %v345_v11, %v347_v7  ;;  %v365_v13 = vsel %vm363_vm10, %v360_v10, %v362_v55 }
 0x177   : > { %619 = vmatpush1.bf16.msra.mxu0 %v351_v12 }
 0x178   : > { %620 = vmatprep.subr.bf16.mxu0 %v365_v13 }
 0x179   : > { %v358_v14 = vpop.permute.xlu0 %357  ;;  %v373_v15 = vpop.permute.xlu1 %372 }
 0x17a   : > { %v364_v16 = vsel %vm363_vm10, %v358_v14, %v360_v10  ;;  %v378_v17 = vsel %vm376_vm11, %v373_v15, %v375_v58  ;;  %v1940_v58 = vld [vmem:[%s3236_s1 + $0x14] ss:$8 sps:$4 sm:$0xff]  }
 0x17b   : > { %621 = vmatpush1.bf16.msra.mxu0 %v364_v16 }
 0x17c   : > { %622 = vmatprep.subr.bf16.mxu0 %v378_v17 }
 0x17d   : > { %v386_v18 = vpop.permute.xlu0 %385  ;;  %v371_v19 = vpop.permute.xlu1 %370 }
 0x17e   : > { %v377_v20 = vsel %vm376_vm11, %v371_v19, %v373_v15  ;;  %v391_v21 = vsel %vm389_vm12, %v386_v18, %v388_v57  ;;  %v1937_v57 = vld [vmem:[%s3236_s1] ss:$8 sps:$4 sm:$0xff]  }
 0x17f   : > { %623 = vmatpush1.bf16.msra.mxu0 %v377_v20 }
 0x180   : > { %624 = vmatprep.subr.bf16.mxu0 %v391_v21 }
 0x181   : > { %v384_v22 = vpop.permute.xlu0 %383  ;;  %v399_v23 = vpop.permute.xlu1 %398 }
 0x182   : > { %v390_v24 = vsel %vm389_vm12, %v384_v22, %v386_v18  ;;  %v404_v25 = vsel %vm402_vm13, %v399_v23, %v401_v60  ;;  %v1943_v60 = vld [vmem:[%s3236_s1 + $0x24] ss:$8 sps:$4 sm:$0xff]  }
 0x183   : > { %625 = vmatpush1.bf16.msra.mxu0 %v390_v24 }
 0x184   : > { %626 = vmatprep.subr.bf16.mxu0 %v404_v25 }
 0x185   : > { %v412_v26 = vpop.permute.xlu0 %411  ;;  %v397_v27 = vpop.permute.xlu1 %396 }
 0x186   : > { %v403_v28 = vsel %vm402_vm13, %v397_v27, %v399_v23  ;;  %v417_v29 = vsel %vm415_vm14, %v412_v26, %v414_v59  ;;  %v1942_v59 = vld [vmem:[%s3236_s1 + $0x10] ss:$8 sps:$4 sm:$0xff]  }
 0x187   : > { %627 = vmatpush1.bf16.msra.mxu0 %v403_v28 }
 0x188   : > { %628 = vmatprep.subr.bf16.mxu0 %v417_v29 }
 0x189   : > { %v410_v30 = vpop.permute.xlu0 %409  ;;  %v425_v31 = vpop.permute.xlu1 %424 }
 0x18a   : > { %v416_v32 = vsel %vm415_vm14, %v410_v30, %v412_v26  ;;  %v430_v33 = vsel %vm428_vm15, %v425_v31, %v427_v62  ;;  %v1946_v62 = vld [vmem:[%s3236_s1 + $0x34] ss:$8 sps:$4 sm:$0xff]  }
 0x18b   : > { %629 = vmatpush1.bf16.msra.mxu0 %v416_v32 }
 0x18c   : > { %630 = vmatprep.subr.bf16.mxu0 %v430_v33 }
 0x18d   : > { %v438_v34 = vpop.permute.xlu0 %437  ;;  %v423_v35 = vpop.permute.xlu1 %422 }
 0x18e   : > { %v429_v36 = vsel %vm428_vm15, %v423_v35, %v425_v31  ;;  %v443_v37 = vsel %vm441_vm0, %v438_v34, %v2497_v61  ;;  %v1945_v61 = vld [vmem:[%s3236_s1 + $0x20] ss:$8 sps:$4 sm:$0xff]  }
 0x18f   : > { %631 = vmatpush1.bf16.msra.mxu0 %v429_v36 }
 0x190   : > { %632 = vmatprep.subr.bf16.mxu0 %v443_v37 }
 0x191   : > { %v436_v38 = vpop.permute.xlu0 %435  ;;  %v451_v39 = vpop.permute.xlu1 %450 }
 0x192   : > { %v442_v40 = vsel %vm441_vm0, %v436_v38, %v438_v34  ;;  %v456_v41 = vsel %vm454_vm1, %v451_v39, %v2499_v63  ;;  %v1948_v63 = vld [vmem:[%s3236_s1 + $0x30] ss:$8 sps:$4 sm:$0xff]  }
 0x193   : > { %633 = vmatpush1.bf16.msra.mxu0 %v442_v40 }
 0x194   : > { %634 = vmatprep.subr.bf16.mxu0 %v456_v41 }
 0x195   : > { %v471_v42 = vpop.permute.xlu0 %470  ;;  %v449_v43 = vpop.permute.xlu1 %448 }
 0x196   : > { %v455_v44 = vsel %vm454_vm1, %v449_v43, %v451_v39 }
 0x197   : > { %635 = vmatpush1.bf16.msra.mxu0 %v455_v44 }
 0x199   : > { %v469_v53 = vpop.permute.xlu0 %468  ;;  %v473_v54 = vpop.permute.xlu1 %472 }
 0x19a   : > { %v476_v55 = vsel %vm474_vm6, %v471_v42, %v473_v54  ;;  %v475_v56 = vsel %vm474_vm6, %v469_v53, %v471_v42 }
 0x19b   : > { %636 = vmatprep.subr.bf16.mxu0 %v476_v55 }
 0x19c   : > { %637 = vmatpush1.bf16.msra.mxu0 %v475_v56 }
 0x19f   : > { %645 = vmatmul.mubr.bf16.vlgmr.msra.gmra.mrb[0].mxu0 %v1937_v57 }
 0x1a0   : > { %1810 = vmatprep.mubr.msk.bf16.mxu0 %vm474_vm6, %v1940_v58 }
 0x1a7   : > { %655 = vmatmul.mubr.bf16.gmra.mrb[4].mxu0 %v1942_v59 }
 0x1a8   : > { %1811 = vmatprep.mubr.msk.bf16.mxu0 %vm474_vm6, %v1943_v60 }
 0x1aa   : > { %v526_v0 = vpop.permute.xlu1 %525  ;;  %v531_v4 = vpop.permute.xlu0 %530 }
 0x1ae   : > { %v536_v10 = vpop.permute.xlu1 %535  ;;  %v546_v30 = vpop.permute.xlu0 %545 }
 0x1af   : > { %665 = vmatmul.mubr.bf16.gmra.mrb[8].mxu0 %v1945_v61 }
 0x1b0   : > { %1812 = vmatprep.mubr.msk.bf16.mxu0 %vm474_vm6, %v1946_v62 }
 0x1b2   : > { %v541_v18 = vpop.permute.xlu1 %540 }
 0x1b6   : > { %v551_v38 = vpop.permute.xlu1 %550 }
 0x1b7   : > { %675 = vmatmul.mubr.bf16.gmra.mrb[12].mxu0 %v1948_v63 }
 0x272   : > { %v646_v1 = vpop.f32.mrb[0].mxu0 }
 0x273   : > { %v647_v2 = vadd.f32 %v646_v1, %v526_v0  ;;  %v648_v3 = vpop.f32.mrb[1].mxu0 }
 0x274   : > { %v649_v5 = vadd.f32 %v648_v3, %v526_v0  ;;  %v650_v6 = vpop.f32.mrb[2].mxu0 }
 0x275   : > { %v685_v7 = vmul.f32 0.5, %v647_v2  ;;  %v651_v8 = vadd.f32 %v650_v6, %v531_v4  ;;  %v652_v9 = vpop.f32.mrb[3].mxu0  ;;  %v556_v2 = vpop.permute.xlu0 %555 }
 0x276   : > { %v686_v11 = vmul.f32 0.5, %v649_v5  ;;  %v653_v12 = vadd.f32 %v652_v9, %v531_v4 }
 0x277   : > { %1953 = vtanh.f32 %v685_v7  ;;  %v687_v13 = vmul.f32 0.5, %v651_v8 }
 0x278   : > { %1955 = vtanh.f32 %v686_v11  ;;  %v688_v14 = vmul.f32 0.5, %v653_v12 }
 0x279   : > { %1957 = vtanh.f32 %v687_v13 }
 0x27a   : > { %1959 = vtanh.f32 %v688_v14  ;;  %v656_v15 = vpop.f32.mrb[4].mxu0 }
 0x27b   : > { %v657_v16 = vadd.f32 %v656_v15, %v536_v10  ;;  %v658_v17 = vpop.f32.mrb[5].mxu0 }
 0x27c   : > { %v659_v19 = vadd.f32 %v658_v17, %v536_v10  ;;  %v660_v20 = vpop.f32.mrb[6].mxu0 }
 0x27d   : > { %v689_v21 = vmul.f32 0.5, %v657_v16  ;;  %v661_v22 = vadd.f32 %v660_v20, %v541_v18  ;;  %v662_v23 = vpop.f32.mrb[7].mxu0 }
 0x27e   : > { %v690_v24 = vmul.f32 0.5, %v659_v19  ;;  %v663_v25 = vadd.f32 %v662_v23, %v541_v18 }
 0x27f   : > { %1961 = vtanh.f32 %v689_v21  ;;  %v691_v26 = vmul.f32 0.5, %v661_v22 }
 0x280   : > { %1963 = vtanh.f32 %v690_v24  ;;  %v692_v27 = vmul.f32 0.5, %v663_v25 }
 0x281   : > { %v1954_v28 = vpop.eup %1953  ;;  %1965 = vtanh.f32 %v691_v26 }
 0x282   : > { %v1956_v29 = vpop.eup %1955  ;;  %1967 = vtanh.f32 %v692_v27  ;;  %v666_v31 = vpop.f32.mrb[8].mxu0  ;;  %v717_v32 = vmul.f32 0.5, %v1954_v28 }
 0x283   : > { %v1958_v33 = vpop.eup %1957  ;;  %v667_v34 = vadd.f32 %v666_v31, %v546_v30  ;;  %v668_v35 = vpop.f32.mrb[9].mxu0  ;;  %v718_v36 = vmul.f32 0.5, %v1956_v29 }
 0x284   : > { %v1960_v37 = vpop.eup %1959  ;;  %v669_v39 = vadd.f32 %v668_v35, %v546_v30  ;;  %v670_v40 = vpop.f32.mrb[10].mxu0  ;;  %v2529_v41 = vadd.f32 0.5, %v717_v32  ;;  %v719_v42 = vmul.f32 0.5, %v1958_v33 }
 0x285   : > { %v693_v43 = vmul.f32 0.5, %v667_v34  ;;  %v671_v44 = vadd.f32 %v670_v40, %v551_v38  ;;  %v672_v53 = vpop.f32.mrb[11].mxu0  ;;  %v2531_v54 = vadd.f32 0.5, %v718_v36  ;;  %v720_v55 = vmul.f32 0.5, %v1960_v37 }
 0x286   : > { %v694_v56 = vmul.f32 0.5, %v669_v39  ;;  %v673_v57 = vadd.f32 %v672_v53, %v551_v38  ;;  %v2533_v58 = vadd.f32 0.5, %v719_v42 }
 0x287   : > { %1969 = vtanh.f32 %v693_v43  ;;  %v695_v59 = vmul.f32 0.5, %v671_v44  ;;  %v749_v60 = vadd.f32 %v2531_v54, %v2529_v41  ;;  %v2537_v61 = vadd.f32 0.5, %v720_v55 }
 0x288   : > { %1971 = vtanh.f32 %v694_v56  ;;  %v696_v62 = vmul.f32 0.5, %v673_v57 }
 0x289   : > { %v1962_v63 = vpop.eup %1961  ;;  %1973 = vtanh.f32 %v695_v59  ;;  %750 = vadd.xlane.f32.xlu1 %v749_v60  ;;  %v752_v0 = vadd.f32 %v2537_v61, %v2533_v58 }
 0x28a   : > { %v1964_v1 = vpop.eup %1963  ;;  %1975 = vtanh.f32 %v696_v62  ;;  %v676_v3 = vpop.f32.mrb[12].mxu0  ;;  %v721_v4 = vmul.f32 0.5, %v1962_v63 }
 0x28b   : > { %v1966_v5 = vpop.eup %1965  ;;  %v677_v6 = vadd.f32 %v676_v3, %v556_v2  ;;  %v678_v7 = vpop.f32.mrb[13].mxu0  ;;  %753 = vadd.xlane.f32.xlu0 %v752_v0  ;;  %v722_v8 = vmul.f32 0.5, %v1964_v1 }
 0x28c   : > { %v1968_v9 = vpop.eup %1967  ;;  %v679_v10 = vadd.f32 %v678_v7, %v556_v2  ;;  %v2541_v11 = vpop.f32.mrb[14].mxu0  ;;  %v2543_v12 = vadd.f32 0.5, %v721_v4  ;;  %v723_v13 = vmul.f32 0.5, %v1966_v5 }
 0x28d   : > { %v697_v14 = vmul.f32 0.5, %v677_v6  ;;  %v2545_v15 = vpop.f32.mrb[15].mxu0  ;;  %v2547_v16 = vadd.f32 0.5, %v722_v8  ;;  %v724_v17 = vmul.f32 0.5, %v1968_v9 }
 0x28e   : > { %v698_v18 = vmul.f32 0.5, %v679_v10  ;;  %v2549_v19 = vadd.f32 0.5, %v723_v13 }
 0x28f   : > { %1977 = vtanh.f32 %v697_v14  ;;  %v755_v20 = vadd.f32 %v2547_v16, %v2543_v12  ;;  %v2553_v21 = vadd.f32 0.5, %v724_v17 }
 0x290   : > { %1979 = vtanh.f32 %v698_v18 }
 0x291   : > { %v1970_v22 = vpop.eup %1969  ;;  %756 = vadd.xlane.f32.xlu0 %v755_v20  ;;  %v758_v23 = vadd.f32 %v2553_v21, %v2549_v19 }
 0x292   : > { %v1972_v24 = vpop.eup %1971  ;;  %v725_v25 = vmul.f32 0.5, %v1970_v22 }
 0x293   : > { %v1974_v26 = vpop.eup %1973  ;;  %759 = vadd.xlane.f32.xlu1 %v758_v23  ;;  %v726_v27 = vmul.f32 0.5, %v1972_v24 }
 0x294   : > { %v1976_v28 = vpop.eup %1975  ;;  %v2557_v29 = vadd.f32 0.5, %v725_v25  ;;  %v727_v30 = vmul.f32 0.5, %v1974_v26 }
 0x295   : > { %v2559_v31 = vadd.f32 0.5, %v726_v27  ;;  %v728_v32 = vmul.f32 0.5, %v1976_v28 }
 0x296   : > { %v2561_v33 = vadd.f32 0.5, %v727_v30  ;;  %v2247_v30 = vmov 7  }
 0x297   : > { %v761_v34 = vadd.f32 %v2559_v31, %v2557_v29  ;;  %v2565_v35 = vadd.f32 0.5, %v728_v32  ;;  %1921 = vset.pattern.permute.xlu1 %v2247_v30 }
 0x299   : > { %v1978_v36 = vpop.eup %1977  ;;  %762 = vadd.xlane.f32.xlu0 %v761_v34  ;;  %v764_v37 = vadd.f32 %v2565_v35, %v2561_v33 }
 0x29a   : > { %v1980_v38 = vpop.eup %1979  ;;  %v729_v39 = vmul.f32 0.5, %v1978_v36 }
 0x29b   : > { %v730_v40 = vmul.f32 0.5, %v1980_v38  ;;  %765 = vadd.xlane.f32.xlu1 %v764_v37 }
 0x29c   : > { %v2569_v42 = vadd.f32 0.5, %v729_v39 }
 0x29d   : > { %v2571_v43 = vadd.f32 0.5, %v730_v40 }
 0x29e   : > { %v767_v44 = vsel %vm299_vm5, %v2569_v42, 0.0 }
 0x29f   : > { %v768_v53 = vsel %vm299_vm5, %v2571_v43, 0.0 }
 0x2a0   : > { %v769_v55 = vadd.f32 %v768_v53, %v767_v44 }
 0x2a2   : > { %770 = vadd.xlane.f32.xlu0 %v769_v55 }
 0x316   : > { %v751_v56 = vpop.xlane.xlu1 %750 }
 0x317   : > { %v2577_v57 = vmul.f32 0.00390625, %v751_v56 }
 0x318   : > { %v754_v59 = vpop.xlane.xlu0 %753 }
 0x319   : > { %v2579_v60 = vmul.f32 0.00390625, %v754_v59  ;;  %v787_v62 = vrot.slane %v2577_v57, 7  ;;  %v803_v2 = vrot.slane %v2577_v57, 1 }
 0x31b   : > { %v788_v63 = vrot.slane %v2579_v60, 7  ;;  %v804_v0 = vrot.slane %v2579_v60, 1  ;;  %v801_v1 = vsel %vm786_vm2, 0.0, %v787_v62 }
 0x31c   : > { %827 = vrot.lane.b32.xlu1 %v801_v1, %s2246_s11  ;;  %v1814_v1 = vld [vmem:[%s3238_s3 + $0x1] ss:$0 sm:$0xff] }
 0x31d   : > { %v789_v3 = vsel %vm786_vm2, %v787_v62, %v788_v63  ;;  %v805_v6 = vsel %vm802_vm3, %v803_v2, %v804_v0  ;;  %v2634_v62 = vld [vmem:[%s3238_s3 + $0x38] sm:$0xff] }
 0x31e   : > { %v757_v4 = vpop.xlane.xlu0 %756  ;;  %829 = vrot.lane.b32.xlu0 %v789_v3, %s2246_s11 }
 0x31f   : > { %v2589_v5 = vmul.f32 0.00390625, %v757_v4 }
 0x320   : > { %878 = vrot.lane.b32.xlu1 %v805_v6, %s2246_s11  ;;  %v760_v7 = vpop.xlane.xlu1 %759  ;;  %v2647_v6 = vld [vmem:[%s3238_s3 + $0x2] ss:$0 sm:$0xff] }
 0x321   : > { %v790_v8 = vrot.slane %v2589_v5, 7  ;;  %v806_v9 = vrot.slane %v2589_v5, 1  ;;  %v2595_v10 = vmul.f32 0.00390625, %v760_v7  ;;  %v859_v7 = vmul.f32 %v1814_v1, %v2577_v57 }
 0x323   : > { %v792_v13 = vrot.slane %v2595_v10, 7  ;;  %v808_v14 = vrot.slane %v2595_v10, 1  ;;  %v807_v17 = vsel %vm802_vm3, %v804_v0, %v806_v9  ;;  %v791_v18 = vsel %vm786_vm2, %v788_v63, %v790_v8  ;;  %v1813_v0 = vld [vmem:[%s3238_s3] ss:$0 sm:$0xff] }
 0x324   : > { %880 = vrot.lane.b32.xlu1 %v807_v17, %s2246_s11  ;;  %831 = vrot.lane.b32.xlu0 %v791_v18, %s2246_s11  ;;  %v860_v17 = vmul.f32 %v1814_v1, %v2579_v60 }
 0x325   : > { %v809_v23 = vsel %vm802_vm3, %v806_v9, %v808_v14  ;;  %v793_v24 = vsel %vm786_vm2, %v790_v8, %v792_v13 }
 0x326   : > { %v763_v20 = vpop.xlane.xlu0 %762 }
 0x327   : > { %v2603_v22 = vmul.f32 0.00390625, %v763_v20 }
 0x328   : > { %882 = vrot.lane.b32.xlu0 %v809_v23, %s2246_s11  ;;  %833 = vrot.lane.b32.xlu1 %v793_v24, %s2246_s11  ;;  %v766_v25 = vpop.xlane.xlu1 %765 }
 0x329   : > { %v794_v26 = vrot.slane %v2603_v22, 7  ;;  %v810_v27 = vrot.slane %v2603_v22, 1  ;;  %v2611_v28 = vmul.f32 0.00390625, %v766_v25 }
 0x32b   : > { %v796_v32 = vrot.slane %v2611_v28, 7  ;;  %v812_v34 = vrot.slane %v2611_v28, 1  ;;  %v795_v36 = vsel %vm786_vm2, %v792_v13, %v794_v26  ;;  %v811_v37 = vsel %vm802_vm3, %v808_v14, %v810_v27 }
 0x32c   : > { %835 = vrot.lane.b32.xlu0 %v795_v36, %s2246_s11  ;;  %884 = vrot.lane.b32.xlu1 %v811_v37, %s2246_s11 }
 0x32d   : > { %v813_v39 = vsel %vm802_vm3, %v810_v27, %v812_v34  ;;  %v797_v40 = vsel %vm786_vm2, %v794_v26, %v796_v32 }
 0x32f   : > { %v771_v38 = vpop.xlane.xlu0 %770 }
 0x330   : > { %v2621_v44 = vmul.f32 0.00390625, %v771_v38  ;;  %886 = vrot.lane.b32.xlu0 %v813_v39, %s2246_s11  ;;  %837 = vrot.lane.b32.xlu1 %v797_v40, %s2246_s11  ;;  %v862_v40 = vmul.f32 %v1814_v1, %v2595_v10 }
 0x332   : > { %v798_v53 = vrot.slane %v2621_v44, 7  ;;  %v814_v55 = vrot.slane %v2621_v44, 1 }
 0x334   : > { %v799_v56 = vsel %vm786_vm2, %v796_v32, %v798_v53  ;;  %v815_v59 = vsel %vm802_vm3, %v812_v34, %v814_v55  ;;  %v818_v63 = vsel %vm817_vm4, %v814_v55, 0.0 }
 0x335   : > { %839 = vrot.lane.b32.xlu0 %v799_v56, %s2246_s11  ;;  %888 = vrot.lane.b32.xlu1 %v815_v59, %s2246_s11 }
 0x339   : > { %560 = vperm.xlu0 %1920, %v2634_v62   ;;  %890 = vrot.lane.b32.xlu1 %v818_v63, %s2246_s11  ;;  %s2153_s11 = scalar_lea.vmem %s3188_s5, 2048 }
 0x33a   : > { %p2154_p4 = scmp.ne.s32.totalorder %s3188_s5, %s2153_s11  ;;  %p2161_p11 = scmp.lt.s32.totalorder %s2159_s23, %s2153_s11 }
 0x33c   : > { %p2155_p6 = pnand %p2154_p4, %p2373_p12  ;;  %p2162_p3 = por %p2161_p11, %p2160_p10 }
 0x33d   : > { %1922 = vset.pattern.permute.xlu0 %v2247_v30  ;;  %v861_v30 = vmul.f32 %v1814_v1, %v2589_v5  ;;  %v863_v5 = vmul.f32 %v1814_v1, %v2603_v22 }
 0x33e   : > { %p2156_p8 = pneg %p2155_p6 }
 0x340   : > { %p2163_p7 = pnand %p2162_p3, %p2156_p8 }
 0x38e   : > { %v828_v2 = vpop.permute.xlu1 %827 }
 0x38f   : > { %v848_v3 = vmul.f32 %v1813_v0, %v828_v2 }
 0x390   : > { %v830_v4 = vpop.permute.xlu0 %829 }
 0x391   : > { %v866_v9 = vadd.f32 %v859_v7, %v848_v3  ;;  %v849_v13 = vmul.f32 %v1813_v0, %v830_v4 }
 0x392   : > { %v879_v8 = vpop.permute.xlu1 %878 }
 0x393   : > { %v899_v14 = vmul.f32 %v2647_v6, %v879_v8  ;;  %v867_v24 = vadd.f32 %v860_v17, %v849_v13 }
 0x395   : > { %v906_v18 = vadd.f32 %v899_v14, %v866_v9 }
 0x396   : > { %v832_v20 = vpop.permute.xlu0 %831  ;;  %v881_v23 = vpop.permute.xlu1 %880 }
 0x397   : > { %v913_v25 = vmul.f32 0.5, %v906_v18  ;;  %v850_v26 = vmul.f32 %v1813_v0, %v832_v20  ;;  %v900_v27 = vmul.f32 %v2647_v6, %v881_v23  ;;  %v864_v20 = vmul.f32 %v1814_v1, %v2611_v28 }
 0x399   : > { %1981 = vtanh.f32 %v913_v25  ;;  %v907_v32 = vadd.f32 %v900_v27, %v867_v24  ;;  %v868_v36 = vadd.f32 %v861_v30, %v850_v26 }
 0x39a   : > { %v883_v57 = vpop.permute.xlu0 %882  ;;  %v834_v34 = vpop.permute.xlu1 %833 }
 0x39b   : > { %v914_v37 = vmul.f32 0.5, %v907_v32  ;;  %v901_v38 = vmul.f32 %v2647_v6, %v883_v57  ;;  %v851_v39 = vmul.f32 %v1813_v0, %v834_v34  ;;  %v865_v34 = vmul.f32 %v1814_v1, %v2621_v44 }
 0x39d   : > { %1983 = vtanh.f32 %v914_v37  ;;  %v908_v60 = vadd.f32 %v901_v38, %v868_v36  ;;  %v869_v59 = vadd.f32 %v862_v40, %v851_v39 }
 0x39e   : > { %v836_v53 = vpop.permute.xlu0 %835  ;;  %v885_v55 = vpop.permute.xlu1 %884 }
 0x39f   : > { %v915_v56 = vmul.f32 0.5, %v908_v60  ;;  %v852_v63 = vmul.f32 %v1813_v0, %v836_v53  ;;  %v902_v2 = vmul.f32 %v2647_v6, %v885_v55 }
 0x3a1   : > { %1985 = vtanh.f32 %v915_v56  ;;  %v909_v3 = vadd.f32 %v902_v2, %v869_v59  ;;  %v870_v9 = vadd.f32 %v863_v5, %v852_v63 }
 0x3a2   : > { %v887_v4 = vpop.permute.xlu0 %886  ;;  %v838_v7 = vpop.permute.xlu1 %837 }
 0x3a3   : > { %v1982_v8 = vpop.eup %1981  ;;  %v916_v13 = vmul.f32 0.5, %v909_v3  ;;  %v903_v14 = vmul.f32 %v2647_v6, %v887_v4  ;;  %v853_v17 = vmul.f32 %v1813_v0, %v838_v7 }
 0x3a4   : > { %v927_v10 = vmul.f32 0.5, %v1982_v8 }
 0x3a5   : > { %1987 = vtanh.f32 %v916_v13  ;;  %v910_v18 = vadd.f32 %v903_v14, %v870_v9  ;;  %v871_v22 = vadd.f32 %v864_v20, %v853_v17  ;;  %v2248_v14 = vmov 1  }
 0x3a6   : > { %v934_v23 = vadd.f32 0.5, %v927_v10  ;;  %v2249_v17 = vmov 2   ;;  %v2250_v10 = vmov 3   ;;  %v2252_v20 = vmov 4  }
 0x3a7   : > { %v1984_v24 = vpop.eup %1983  ;;  %v917_v25 = vmul.f32 0.5, %v910_v18  ;;  %v840_v26 = vpop.permute.xlu0 %839  ;;  %v2251_v18 = vmov 5  }
 0x3a8   : > { %v889_v27 = vpop.permute.xlu1 %888  ;;  %v854_v30 = vmul.f32 %v1813_v0, %v840_v26  ;;  %944 = vperm.xlu1 %1921, %v934_v23   ;;  %v928_v57 = vmul.f32 0.5, %v1984_v24  ;;  %v2253_v23 = vmov 6  }
 0x3a9   : > { %v904_v32 = vmul.f32 %v2647_v6, %v889_v27  ;;  %1989 = vtanh.f32 %v917_v25 }
 0x3aa   : > { %v935_v37 = vadd.f32 0.5, %v928_v57  ;;  %v872_v60 = vadd.f32 %v865_v34, %v854_v30 }
 0x3ab   : > { %v911_v36 = vadd.f32 %v904_v32, %v871_v22  ;;  %v1986_v38 = vpop.eup %1985 }
 0x3ac   : > { %v891_v39 = vpop.permute.xlu1 %890  ;;  %949 = vperm.xlu0 %1922, %v935_v37   ;;  %v929_v53 = vmul.f32 0.5, %v1986_v38 }
 0x3ad   : > { %v918_v28 = vmul.f32 0.5, %v911_v36  ;;  %v905_v40 = vmul.f32 %v2647_v6, %v891_v39 }
 0x3ae   : > { %v936_v0 = vadd.f32 0.5, %v929_v53 }
 0x3af   : > { %1991 = vtanh.f32 %v918_v28  ;;  %v912_v55 = vadd.f32 %v905_v40, %v872_v60  ;;  %v1988_v56 = vpop.eup %1987 }
 0x3b0   : > { %954 = vperm.xlu1 %1921, %v936_v0   ;;  %v930_v63 = vmul.f32 0.5, %v1988_v56 }
 0x3b1   : > { %v919_v59 = vmul.f32 0.5, %v912_v55 }
 0x3b2   : > { %v937_v2 = vadd.f32 0.5, %v930_v63 }
 0x3b3   : > { %1993 = vtanh.f32 %v919_v59  ;;  %v1990_v44 = vpop.eup %1989 }
 0x3b4   : > { %959 = vperm.xlu1 %1921, %v937_v2   ;;  %v931_v1 = vmul.f32 0.5, %v1990_v44 }
 0x3b6   : > { %v938_v5 = vadd.f32 0.5, %v931_v1 }
 0x3b8   : > { %964 = vperm.xlu0 %1922, %v938_v5   ;;  %v561_v24 = vpop.permute.xlu0 %560 }
 0x3b9   : > { %v1992_v3 = vpop.eup %1991  ;;  %v681_v25 = vadd.f32 %v2541_v11, %v561_v24  ;;  %v683_v26 = vadd.f32 %v2545_v15, %v561_v24 }
 0x3ba   : > { %v932_v4 = vmul.f32 0.5, %v1992_v3 }
 0x3bb   : > { %v699_v22 = vmul.f32 0.5, %v681_v25  ;;  %v700_v11 = vmul.f32 0.5, %v683_v26 }
 0x3bc   : > { %v939_v7 = vadd.f32 0.5, %v932_v4 }
 0x3bd   : > { %v1994_v6 = vpop.eup %1993  ;;  %1995 = vtanh.f32 %v699_v22 }
 0x3be   : > { %969 = vperm.xlu1 %1921, %v939_v7   ;;  %v933_v8 = vmul.f32 0.5, %v1994_v6  ;;  %1997 = vtanh.f32 %v700_v11 }
 0x3c0   : > { %v940_v9 = vadd.f32 0.5, %v933_v8 }
 0x3c2   : > { %v941_v13 = vsel %vm299_vm5, %v940_v9, 1.0  ;;  %1923 = vset.pattern.permute.xlu1 %v2248_v14  ;;  %vm1034_vm5 = vcmask 523264  }
 0x3c3   : > { %974 = vperm.xlu0 %1922, %v941_v13   ;;  %1121 = vperm.xlu1 %1923, %v2455_v45  }
 0x3c7   : > { %1924 = vset.pattern.permute.xlu0 %v2248_v14  ;;  %1129 = vperm.xlu1 %1923, %v2469_v48  }
 0x3c8   : > { %1125 = vperm.xlu0 %1924, %v2460_v46  }
 0x3cb   : > { %1133 = vperm.xlu1 %1923, %v2482_v50  }
 0x3cc   : > { %1137 = vperm.xlu0 %1924, %v2474_v49  }
 0x3cf   : > { %1141 = vperm.xlu1 %1923, %v2494_v52  }
 0x3d0   : > { %1145 = vperm.xlu0 %1924, %v2487_v51  }
 0x3d3   : > { %1149 = vperm.xlu1 %1923, %v2634_v62  }
 0x3d4   : > { %1925 = vset.pattern.permute.xlu0 %v2249_v17 }
 0x3d5   : > { %1169 = vperm.xlu0 %1925, %v2455_v45  }
 0x3d7   : > { %1926 = vset.pattern.permute.xlu1 %v2249_v17 }
 0x3d8   : > { %1173 = vperm.xlu1 %1926, %v2460_v46  }
 0x3d9   : > { %1181 = vperm.xlu0 %1925, %v2482_v50  }
 0x3dc   : > { %1177 = vperm.xlu1 %1926, %v2469_v48  }
 0x3dd   : > { %1189 = vperm.xlu0 %1925, %v2494_v52  }
 0x3e0   : > { %1185 = vperm.xlu1 %1926, %v2474_v49  }
 0x3e1   : > { %1197 = vperm.xlu0 %1925, %v2634_v62  }
 0x3e4   : > { %1193 = vperm.xlu1 %1926, %v2487_v51  }
 0x3e5   : > { %1928 = vset.pattern.permute.xlu0 %v2250_v10 }
 0x3e6   : > { %1301 = vperm.xlu0 %1928, %v2460_v46  }
 0x3e8   : > { %1927 = vset.pattern.permute.xlu1 %v2250_v10 }
 0x3e9   : > { %1297 = vperm.xlu1 %1927, %v2455_v45  }
 0x3ea   : > { %1313 = vperm.xlu0 %1928, %v2474_v49  }
 0x3ed   : > { %1305 = vperm.xlu1 %1927, %v2469_v48  }
 0x3ee   : > { %1321 = vperm.xlu0 %1928, %v2487_v51  }
 0x3f1   : > { %1309 = vperm.xlu1 %1927, %v2482_v50  }
 0x3f2   : > { %1930 = vset.pattern.permute.xlu0 %v2251_v18 }
 0x3f3   : > { %1481 = vperm.xlu0 %1930, %v2469_v48  }
 0x3f5   : > { %1317 = vperm.xlu1 %1927, %v2494_v52  }
 0x3f7   : > { %1493 = vperm.xlu0 %1930, %v2494_v52  }
 0x3f9   : > { %1325 = vperm.xlu1 %1927, %v2634_v62  }
 0x3fb   : > { %1501 = vperm.xlu0 %1930, %v2634_v62  }
 0x3fd   : > { %1929 = vset.pattern.permute.xlu1 %v2251_v18 }
 0x3fe   : > { %1473 = vperm.xlu1 %1929, %v2455_v45  }
 0x3ff   : > { %1931 = vset.pattern.permute.xlu0 %v2252_v20 }
 0x400   : > { %1345 = vperm.xlu0 %1931, %v2455_v45  }
 0x402   : > { %1477 = vperm.xlu1 %1929, %v2460_v46  }
 0x404   : > { %1353 = vperm.xlu0 %1931, %v2469_v48  }
 0x406   : > { %1485 = vperm.xlu1 %1929, %v2482_v50  }
 0x408   : > { %1365 = vperm.xlu0 %1931, %v2494_v52  }
 0x40a   : > { %1489 = vperm.xlu1 %1929, %v2474_v49  }
 0x40c   : > { %1373 = vperm.xlu0 %1931, %v2634_v62  }
 0x40e   : > { %1497 = vperm.xlu1 %1929, %v2487_v51  }
 0x410   : > { %1934 = vset.pattern.permute.xlu0 %v2253_v23 }
 0x411   : > { %1525 = vperm.xlu0 %1934, %v2460_v46  }
 0x412   : > { %1932 = vset.pattern.permute.xlu1 %v2252_v20 }
 0x413   : > { %1349 = vperm.xlu1 %1932, %v2460_v46  }
 0x415   : > { %1537 = vperm.xlu0 %1934, %v2474_v49  }
 0x417   : > { %1357 = vperm.xlu1 %1932, %v2482_v50  }
 0x419   : > { %1545 = vperm.xlu0 %1934, %v2487_v51  }
 0x41b   : > { %1361 = vperm.xlu1 %1932, %v2474_v49  }
 0x41f   : > { %1369 = vperm.xlu1 %1932, %v2487_v51  }
 0x423   : > { %1933 = vset.pattern.permute.xlu1 %v2253_v23 }
 0x424   : > { %1521 = vperm.xlu1 %1933, %v2455_v45   ;;  %v1996_v45 = vpop.eup %1995 }
 0x425   : > { %v1998_v60 = vpop.eup %1997 }
 0x426   : > { %v732_v40 = vmul.f32 0.5, %v1998_v60 }
 0x427   : > { %v945_v27 = vpop.permute.xlu1 %944 }
 0x428   : > { %v982_v46 = vmul.f32 %v945_v27, %v2529_v41  ;;  %v983_v32 = vmul.f32 %v945_v27, %v2531_v54  ;;  %1529 = vperm.xlu1 %1933, %v2469_v48   ;;  %v748_v56 = vadd.f32 0.5, %v732_v40 }
 0x42b   : > { %v950_v30 = vpop.permute.xlu0 %949 }
 0x42c   : > { %v984_v57 = vmul.f32 %v950_v30, %v2533_v58  ;;  %v985_v34 = vmul.f32 %v950_v30, %v2537_v61  ;;  %1533 = vperm.xlu1 %1933, %v2482_v50  }
 0x42e   : > { %v1007_v36 = vpack.c.bf16 %v985_v34, %v983_v32  ;;  %v1006_v49 = vpack.c.bf16 %v984_v57, %v982_v46 }
 0x42f   : > { %v955_v37 = vpop.permute.xlu1 %954 }
 0x430   : > { %1047 = vmatprep.subr.bf16.mxu1 %v1007_v36  ;;  %v986_v41 = vmul.f32 %v955_v37, %v2543_v12  ;;  %v987_v54 = vmul.f32 %v955_v37, %v2547_v16  ;;  %1541 = vperm.xlu1 %1933, %v2494_v52  }
 0x431   : > { %1048 = vmatpush1.bf16.msra.mxu1 %v1006_v49 }
 0x433   : > { %v960_v51 = vpop.permute.xlu1 %959 }
 0x434   : > { %v988_v58 = vmul.f32 %v960_v51, %v2549_v19  ;;  %v989_v61 = vmul.f32 %v960_v51, %v2553_v21  ;;  %v731_v21 = vmul.f32 0.5, %v1996_v45  ;;  %1549 = vperm.xlu1 %1933, %v2634_v62   ;;  %v1951_v62 = vld [vmem:[#allocation6 + $0x10] sm:$0xff]  }
 0x436   : > { %v1008_v15 = vpack.c.bf16 %v988_v58, %v986_v41  ;;  %v1009_v38 = vpack.c.bf16 %v989_v61, %v987_v54  ;;  %v747_v0 = vadd.f32 0.5, %v731_v21 }
 0x437   : > { %v965_v39 = vpop.permute.xlu0 %964 }
 0x438   : > { %1049 = vmatprep.subr.bf16.mxu1 %v1009_v38  ;;  %v990_v12 = vmul.f32 %v965_v39, %v2557_v29  ;;  %v991_v16 = vmul.f32 %v965_v39, %v2559_v31 }
 0x439   : > { %1050 = vmatpush1.bf16.msra.mxu1 %v1008_v15 }
 0x43d   : > { %v970_v28 = vpop.permute.xlu1 %969 }
 0x43e   : > { %v992_v19 = vmul.f32 %v970_v28, %v2561_v33  ;;  %v993_v48 = vmul.f32 %v970_v28, %v2565_v35  ;;  %v1949_v33 = vld [vmem:[#allocation6] sm:$0xff]   ;;  %v1950_v35 = vld [vmem:[#allocation6 + $0x8] sm:$0xff]  }
 0x440   : > { %v1010_v53 = vpack.c.bf16 %v992_v19, %v990_v12  ;;  %v1011_v55 = vpack.c.bf16 %v993_v48, %v991_v16 }
 0x442   : > { %v975_v50 = vpop.permute.xlu0 %974  ;;  %1051 = vmatprep.subr.bf16.mxu1 %v1011_v55 }
 0x443   : > { %v994_v52 = vmul.f32 %v975_v50, %v2569_v42  ;;  %v995_v29 = vmul.f32 %v975_v50, %v2571_v43  ;;  %1052 = vmatpush1.bf16.msra.mxu1 %v1010_v53  ;;  %v1952_v42 = vld [vmem:[#allocation6 + $0x18] sm:$0xff]   ;;  %v1122_v43 = vpop.permute.xlu1 %1121 }
 0x445   : > { %v1012_v31 = vpack.c.bf16 %v747_v0, %v994_v52  ;;  %v1013_v59 = vpack.c.bf16 %v748_v56, %v995_v29 }
 0x447   : > { %1053 = vmatprep.subr.bf16.mxu1 %v1013_v59  ;;  %v1130_v63 = vpop.permute.xlu1 %1129  ;;  %v1126_v6 = vpop.permute.xlu0 %1125 }
 0x448   : > { %1054 = vmatpush1.bf16.msra.mxu1 %v1012_v31 }
 0x44b   : > { %1820 = vmatmul.mubr.msk.bf16.vlgmr.msra.gmra.mrb[0].mxu1 %vm1034_vm5, %v1949_v33  ;;  %v1134_v2 = vpop.permute.xlu1 %1133  ;;  %v2741_v9 = vpop.permute.xlu0 %1137 }
 0x44c   : > { %1089 = vmatprep.mubr.bf16.mxu1 %v2245_v47 }
 0x44f   : > { %v2731_v44 = vpop.permute.xlu1 %1141  ;;  %v2745_v13 = vpop.permute.xlu0 %1145 }
 0x453   : > { %1821 = vmatmul.mubr.msk.bf16.gmra.mrb[4].mxu1 %vm1034_vm5, %v1950_v35  ;;  %v2733_v1 = vpop.permute.xlu1 %1149 }
 0x454   : > { %1099 = vmatprep.mubr.bf16.mxu1 %v2245_v47  ;;  %v1170_v17 = vpop.permute.xlu0 %1169 }
 0x457   : > { %v1174_v5 = vpop.permute.xlu1 %1173 }
 0x458   : > { %v1182_v18 = vpop.permute.xlu0 %1181 }
 0x45b   : > { %1822 = vmatmul.mubr.msk.bf16.gmra.mrb[8].mxu1 %vm1034_vm5, %v1951_v62  ;;  %v1178_v3 = vpop.permute.xlu1 %1177 }
 0x45c   : > { %1109 = vmatprep.mubr.bf16.mxu1 %v2245_v47  ;;  %v2753_v23 = vpop.permute.xlu0 %1189 }
 0x45f   : > { %v2735_v4 = vpop.permute.xlu1 %1185 }
 0x460   : > { %v2757_v25 = vpop.permute.xlu0 %1197 }
 0x463   : > { %1823 = vmatmul.mubr.msk.bf16.gmra.mrb[12].mxu1 %vm1034_vm5, %v1952_v42  ;;  %v2737_v7 = vpop.permute.xlu1 %1193 }
 0x465   : > { %v2761_v27 = vpop.permute.xlu0 %1301 }
 0x468   : > { %v2739_v8 = vpop.permute.xlu1 %1297 }
 0x469   : > { %v2765_v30 = vpop.permute.xlu0 %1313 }
 0x46c   : > { %v2743_v47 = vpop.permute.xlu1 %1305 }
 0x46d   : > { %v2769_v32 = vpop.permute.xlu0 %1321 }
 0x470   : > { %v2747_v14 = vpop.permute.xlu1 %1309 }
 0x472   : > { %v2780_v45 = vpop.permute.xlu0 %1481 }
 0x474   : > { %v2749_v10 = vpop.permute.xlu1 %1317 }
 0x476   : > { %v2791_v56 = vpop.permute.xlu0 %1493 }
 0x478   : > { %v2751_v20 = vpop.permute.xlu1 %1325 }
 0x47d   : > { %v2755_v24 = vpop.permute.xlu1 %1473 }
 0x481   : > { %v2759_v26 = vpop.permute.xlu1 %1477 }
 0x485   : > { %v2763_v22 = vpop.permute.xlu1 %1485 }
 0x489   : > { %v2767_v46 = vpop.permute.xlu1 %1489 }
 0x48d   : > { %v2771_v37 = vpop.permute.xlu1 %1497 }
 0x48e   : > { %3255 = vst [vmem:[#allocation12_spill] sm:$0xff] %v2771_v37 }
 0x492   : > { %v2786_v12 = vpop.permute.xlu1 %1349 }
 0x496   : > { %v2796_v59 = vpop.permute.xlu1 %1357 }
 0x51e   : > { %v1081_v57 = vpop.f32.mrb[0].mxu1 }
 0x51f   : > { %v1152_v34 = vmul.f32 %v1122_v43, %v1081_v57  ;;  %v1083_v11 = vpop.f32.mrb[1].mxu1  ;;  %v2806_v57 = vpop.permute.xlu0 %1501 }
 0x520   : > { %v1153_v36 = vmul.f32 %v1122_v43, %v1083_v11  ;;  %v1085_v49 = vpop.f32.mrb[2].mxu1 }
 0x521   : > { %v2773_v51 = vadd.f32 %v1170_v17, %v1152_v34  ;;  %v1154_v41 = vmul.f32 %v1126_v6, %v1085_v49  ;;  %v1087_v54 = vpop.f32.mrb[3].mxu1  ;;  %v2809_v49 = vpop.permute.xlu1 %1361 }
 0x522   : > { %v2775_v58 = vadd.f32 %v1170_v17, %v1153_v36  ;;  %v1155_v61 = vmul.f32 %v1126_v6, %v1087_v54 }
 0x523   : > { %v1216_v15 = vmul.f32 0.5, %v2773_v51  ;;  %v2778_v38 = vadd.f32 %v1174_v5, %v1154_v41 }
 0x524   : > { %v1217_v39 = vmul.f32 0.5, %v2775_v58  ;;  %v2783_v60 = vadd.f32 %v1174_v5, %v1155_v61 }
 0x525   : > { %1999 = vtanh.f32 %v1216_v15  ;;  %v1218_v28 = vmul.f32 0.5, %v2778_v38 }
 0x526   : > { %2001 = vtanh.f32 %v1217_v39  ;;  %v1219_v16 = vmul.f32 0.5, %v2783_v60  ;;  %v1091_v19 = vpop.f32.mrb[4].mxu1 }
 0x527   : > { %2003 = vtanh.f32 %v1218_v28  ;;  %v1156_v48 = vmul.f32 %v1130_v63, %v1091_v19  ;;  %v1093_v21 = vpop.f32.mrb[5].mxu1 }
 0x528   : > { %2005 = vtanh.f32 %v1219_v16  ;;  %v1157_v40 = vmul.f32 %v1130_v63, %v1093_v21  ;;  %v1095_v53 = vpop.f32.mrb[6].mxu1 }
 0x529   : > { %v2789_v55 = vadd.f32 %v1178_v3, %v1156_v48  ;;  %v1158_v50 = vmul.f32 %v1134_v2, %v1095_v53  ;;  %v1097_v0 = vpop.f32.mrb[7].mxu1 }
 0x52a   : > { %v2793_v52 = vadd.f32 %v1178_v3, %v1157_v40  ;;  %v1159_v29 = vmul.f32 %v1134_v2, %v1097_v0 }
 0x52b   : > { %v1220_v31 = vmul.f32 0.5, %v2789_v55  ;;  %v2798_v33 = vadd.f32 %v1182_v18, %v1158_v50 }
 0x52c   : > { %v1221_v35 = vmul.f32 0.5, %v2793_v52  ;;  %v2801_v62 = vadd.f32 %v1182_v18, %v1159_v29 }
 0x52d   : > { %2007 = vtanh.f32 %v1220_v31  ;;  %v1222_v42 = vmul.f32 0.5, %v2798_v33 }
 0x52e   : > { %2009 = vtanh.f32 %v1221_v35  ;;  %v1223_v43 = vmul.f32 0.5, %v2801_v62  ;;  %v1101_v63 = vpop.f32.mrb[8].mxu1 }
 0x52f   : > { %v2000_v5 = vpop.eup %1999  ;;  %2011 = vtanh.f32 %v1222_v42  ;;  %v1160_v2 = vmul.f32 %v2741_v9, %v1101_v63  ;;  %v1103_v3 = vpop.f32.mrb[9].mxu1 }
 0x530   : > { %v2002_v6 = vpop.eup %2001  ;;  %v1248_v17 = vmul.f32 0.5, %v2000_v5  ;;  %2013 = vtanh.f32 %v1223_v43  ;;  %v1161_v18 = vmul.f32 %v2741_v9, %v1103_v3  ;;  %v1105_v34 = vpop.f32.mrb[10].mxu1 }
 0x531   : > { %v2004_v11 = vpop.eup %2003  ;;  %v1249_v36 = vmul.f32 0.5, %v2002_v6  ;;  %v2812_v41 = vadd.f32 %v2735_v4, %v1160_v2  ;;  %v1162_v54 = vmul.f32 %v2731_v44, %v1105_v34  ;;  %v1107_v61 = vpop.f32.mrb[11].mxu1 }
 0x532   : > { %v2006_v15 = vpop.eup %2005  ;;  %v1264_v39 = vadd.f32 0.5, %v1248_v17  ;;  %v1250_v28 = vmul.f32 0.5, %v2004_v11  ;;  %v2816_v16 = vadd.f32 %v2735_v4, %v1161_v18  ;;  %v1163_v19 = vmul.f32 %v2731_v44, %v1107_v61  ;;  %v1346_v42 = vpop.permute.xlu0 %1345 }
 0x533   : > { %v1265_v9 = vadd.f32 0.5, %v1249_v36  ;;  %v1251_v48 = vmul.f32 0.5, %v2006_v15  ;;  %v1224_v21 = vmul.f32 0.5, %v2812_v41  ;;  %v2821_v40 = vadd.f32 %v2753_v23, %v1162_v54  ;;  %v2847_v2 = vpop.permute.xlu1 %1369 }
 0x534   : > { %v2824_v53 = vmul.f32 %v1264_v39, %v2773_v51  ;;  %v1266_v50 = vadd.f32 0.5, %v1250_v28  ;;  %v1225_v0 = vmul.f32 0.5, %v2816_v16  ;;  %v2828_v29 = vadd.f32 %v2753_v23, %v1163_v19 }
 0x535   : > { %v2831_v4 = vmul.f32 %v1265_v9, %v2775_v58  ;;  %v1267_v44 = vadd.f32 0.5, %v1251_v48  ;;  %2015 = vtanh.f32 %v1224_v21  ;;  %v1226_v31 = vmul.f32 0.5, %v2821_v40 }
 0x536   : > { %v2835_v35 = vmul.f32 %v1266_v50, %v2778_v38  ;;  %v1328_v51 = vmul.f32 %v2739_v8, %v2824_v53  ;;  %2017 = vtanh.f32 %v1225_v0  ;;  %v1227_v43 = vmul.f32 0.5, %v2828_v29  ;;  %v2840_v63 = vpop.f32.mrb[12].mxu1 }
 0x537   : > { %v2008_v23 = vpop.eup %2007  ;;  %v2843_v58 = vmul.f32 %v1267_v44, %v2783_v60  ;;  %v1329_v5 = vmul.f32 %v2739_v8, %v2831_v4  ;;  %2019 = vtanh.f32 %v1226_v31  ;;  %v1504_v38 = vmul.f32 %v2755_v24, %v2824_v53  ;;  %v2851_v3 = vpop.f32.mrb[13].mxu1 }
 0x538   : > { %v2010_v6 = vpop.eup %2009  ;;  %v1330_v17 = vmul.f32 %v2761_v27, %v2835_v35  ;;  %v1252_v18 = vmul.f32 0.5, %v2008_v23  ;;  %v2855_v34 = vadd.f32 %v1346_v42, %v1328_v51  ;;  %2021 = vtanh.f32 %v1227_v43  ;;  %v2857_v60 = vpop.f32.mrb[14].mxu1 }
 0x539   : > { %v2012_v11 = vpop.eup %2011  ;;  %v1331_v8 = vmul.f32 %v2761_v27, %v2843_v58  ;;  %v1253_v36 = vmul.f32 0.5, %v2010_v6  ;;  %v2861_v54 = vadd.f32 %v1346_v42, %v1329_v5  ;;  %v1505_v61 = vmul.f32 %v2755_v24, %v2831_v4  ;;  %v2865_v15 = vpop.f32.mrb[15].mxu1 }
 0x53a   : > { %v2014_v39 = vpop.eup %2013  ;;  %v2868_v28 = vadd.f32 %v2786_v12, %v1330_v17  ;;  %v1268_v19 = vadd.f32 0.5, %v1252_v18  ;;  %v1254_v9 = vmul.f32 0.5, %v2012_v11  ;;  %v1392_v48 = vmul.f32 0.5, %v2855_v34  ;;  %v1354_v42 = vpop.permute.xlu0 %1353 }
 0x53b   : > { %v2872_v21 = vadd.f32 %v2786_v12, %v1331_v8  ;;  %v1269_v27 = vadd.f32 0.5, %v1253_v36  ;;  %v1393_v50 = vmul.f32 0.5, %v2861_v54  ;;  %v1255_v0 = vmul.f32 0.5, %v2014_v39  ;;  %v1522_v23 = vpop.permute.xlu1 %1521 }
 0x53c   : > { %v1394_v44 = vmul.f32 0.5, %v2868_v28  ;;  %v2877_v24 = vmul.f32 %v1268_v19, %v2789_v55  ;;  %v1270_v31 = vadd.f32 0.5, %v1254_v9  ;;  %2023 = vtanh.f32 %v1392_v48 }
 0x53d   : > { %v1395_v51 = vmul.f32 0.5, %v2872_v21  ;;  %v2881_v43 = vmul.f32 %v1269_v27, %v2793_v52  ;;  %2025 = vtanh.f32 %v1393_v50  ;;  %v1271_v12 = vadd.f32 0.5, %v1255_v0 }
 0x53e   : > { %2027 = vtanh.f32 %v1394_v44  ;;  %v2884_v5 = vmul.f32 %v1270_v31, %v2798_v33  ;;  %v1332_v6 = vmul.f32 %v2743_v47, %v2877_v24  ;;  %v2888_v55 = vadd.f32 %v1522_v23, %v1504_v38  ;;  %v2912_v44 = vpop.permute.xlu0 %1365 }
 0x53f   : > { %v2016_v17 = vpop.eup %2015  ;;  %2029 = vtanh.f32 %v1395_v51  ;;  %v2891_v18 = vmul.f32 %v1271_v12, %v2801_v62  ;;  %v1333_v52 = vmul.f32 %v2743_v47, %v2881_v43  ;;  %v2895_v11 = vadd.f32 %v1522_v23, %v1505_v61 }
 0x540   : > { %v2018_v8 = vpop.eup %2017  ;;  %v2899_v33 = vmul.f32 %v2747_v14, %v2884_v5  ;;  %v2901_v36 = vadd.f32 %v1354_v42, %v1332_v6  ;;  %v1256_v39 = vmul.f32 0.5, %v2016_v17  ;;  %v1568_v38 = vmul.f32 0.5, %v2888_v55 }
 0x541   : > { %v2020_v19 = vpop.eup %2019  ;;  %v2906_v62 = vmul.f32 %v2747_v14, %v2891_v18  ;;  %v2908_v9 = vadd.f32 %v1354_v42, %v1333_v52  ;;  %v1257_v47 = vmul.f32 0.5, %v2018_v8  ;;  %v1569_v61 = vmul.f32 0.5, %v2895_v11 }
 0x542   : > { %v2022_v48 = vpop.eup %2021  ;;  %v1396_v27 = vmul.f32 0.5, %v2901_v36  ;;  %v1272_v50 = vadd.f32 0.5, %v1256_v39  ;;  %v1258_v0 = vmul.f32 0.5, %v2020_v19  ;;  %2031 = vtanh.f32 %v1568_v38 }
 0x543   : > { %v1397_v31 = vmul.f32 0.5, %v2908_v9  ;;  %v1273_v51 = vadd.f32 0.5, %v1257_v47  ;;  %v1259_v12 = vmul.f32 0.5, %v2022_v48  ;;  %2033 = vtanh.f32 %v1569_v61 }
 0x544   : > { %2035 = vtanh.f32 %v1396_v27  ;;  %v2916_v14 = vmul.f32 %v1272_v50, %v2812_v41  ;;  %v1274_v42 = vadd.f32 0.5, %v1258_v0  ;;  %v1164_v23 = vmul.f32 %v2745_v13, %v2840_v63 }
 0x545   : > { %2037 = vtanh.f32 %v1397_v31  ;;  %v2921_v6 = vmul.f32 %v1273_v51, %v2816_v16  ;;  %v1275_v17 = vadd.f32 0.5, %v1259_v12  ;;  %v1508_v52 = vmul.f32 %v2780_v45, %v2877_v24  ;;  %v1530_v16 = vpop.permute.xlu1 %1529  ;;  %v2948_v31 = vpop.permute.xlu0 %1373 }
 0x546   : > { %v2024_v8 = vpop.eup %2023  ;;  %v2927_v39 = vmul.f32 %v2765_v30, %v2916_v14  ;;  %v2930_v41 = vmul.f32 %v1274_v42, %v2821_v40  ;;  %v2933_v38 = vadd.f32 %v2737_v7, %v1164_v23  ;;  %v1509_v63 = vmul.f32 %v2780_v45, %v2881_v43 }
 0x547   : > { %v2026_v19 = vpop.eup %2025  ;;  %v1424_v47 = vmul.f32 0.5, %v2024_v8  ;;  %v2939_v61 = vmul.f32 %v2765_v30, %v2921_v6  ;;  %v2942_v48 = vmul.f32 %v1275_v17, %v2828_v29  ;;  %v2944_v27 = vadd.f32 %v1530_v16, %v1508_v52 }
 0x548   : > { %v2028_v40 = vpop.eup %2027  ;;  %v1425_v50 = vmul.f32 0.5, %v2026_v19  ;;  %v1338_v0 = vmul.f32 %v2749_v10, %v2930_v41  ;;  %v1228_v45 = vmul.f32 0.5, %v2933_v38  ;;  %v2951_v51 = vadd.f32 %v1530_v16, %v1509_v63 }
 0x549   : > { %v2030_v12 = vpop.eup %2029  ;;  %v1426_v42 = vmul.f32 0.5, %v2028_v40  ;;  %v1440_v30 = vadd.f32 0.5, %v1424_v47  ;;  %v2955_v29 = vmul.f32 %v2749_v10, %v2942_v48  ;;  %v1572_v23 = vmul.f32 0.5, %v2944_v27 }
 0x54a   : > { %v1427_v17 = vmul.f32 0.5, %v2030_v12  ;;  %v1441_v52 = vadd.f32 0.5, %v1425_v50  ;;  %v2959_v8 = vadd.f32 %v2912_v44, %v1338_v0  ;;  %2039 = vtanh.f32 %v1228_v45 }
 0x54b   : > { %v1442_v19 = vadd.f32 0.5, %v1426_v42  ;;  %v1456_v37 = vmul.f32 %v1440_v30, %v2855_v34  ;;  %v1573_v63 = vmul.f32 0.5, %v2951_v51  ;;  %2041 = vtanh.f32 %v1572_v23 }
 0x54c   : > { %v2032_v16 = vpop.eup %2031  ;;  %v1443_v47 = vadd.f32 0.5, %v1427_v17  ;;  %v1457_v40 = vmul.f32 %v1441_v52, %v2861_v54  ;;  %v1402_v10 = vmul.f32 0.5, %v2959_v8  ;;  %v1165_v12 = vmul.f32 %v2745_v13, %v2851_v3  ;;  %v1526_v13 = vpop.permute.xlu0 %1525 }
 0x54d   : > { %v2034_v50 = vpop.eup %2033  ;;  %v2968_v0 = vmul.f32 %v1442_v19, %v2868_v28  ;;  %v1600_v45 = vmul.f32 0.5, %v2032_v16  ;;  %2043 = vtanh.f32 %v1573_v63  ;;  %v1166_v34 = vmul.f32 %v2733_v1, %v2857_v60 }
 0x54e   : > { %v2036_v42 = vpop.eup %2035  ;;  %v2973_v30 = vmul.f32 %v1443_v47, %v2872_v21  ;;  %2045 = vtanh.f32 %v1402_v10  ;;  %v1601_v54 = vmul.f32 0.5, %v2034_v50  ;;  %v2976_v23 = vadd.f32 %v2737_v7, %v1165_v12 }
 0x54f   : > { %v2038_v3 = vpop.eup %2037  ;;  %v1428_v17 = vmul.f32 0.5, %v2036_v42  ;;  %v1616_v28 = vadd.f32 0.5, %v1600_v45  ;;  %v2979_v52 = vadd.f32 %v2757_v25, %v1166_v34  ;;  %v1506_v60 = vmul.f32 %v2759_v26, %v2835_v35 }
 0x550   : > { %v1429_v19 = vmul.f32 0.5, %v2038_v3  ;;  %v1617_v63 = vadd.f32 0.5, %v1601_v54  ;;  %v1229_v21 = vmul.f32 0.5, %v2976_v23  ;;  %v1507_v16 = vmul.f32 %v2759_v26, %v2843_v58 }
 0x551   : > { %v1444_v47 = vadd.f32 0.5, %v1428_v17  ;;  %v1632_v7 = vmul.f32 %v1616_v28, %v2888_v55  ;;  %v1230_v10 = vmul.f32 0.5, %v2979_v52  ;;  %v2989_v12 = vadd.f32 %v1526_v13, %v1506_v60 }
 0x552   : > { %v1445_v50 = vadd.f32 0.5, %v1429_v19  ;;  %v1633_v45 = vmul.f32 %v1617_v63, %v2895_v11  ;;  %2047 = vtanh.f32 %v1229_v21  ;;  %v2992_v34 = vadd.f32 %v1526_v13, %v1507_v16 }
 0x553   : > { %v1460_v42 = vmul.f32 %v1444_v47, %v2901_v36  ;;  %v1648_v54 = vadd.f32 %v1632_v7, %v1456_v37  ;;  %2049 = vtanh.f32 %v1230_v10  ;;  %v1570_v26 = vmul.f32 0.5, %v2989_v12 }
 0x554   : > { %v2040_v3 = vpop.eup %2039  ;;  %v1461_v17 = vmul.f32 %v1445_v50, %v2908_v9  ;;  %v1649_v55 = vadd.f32 %v1633_v45, %v1457_v40  ;;  %v1571_v28 = vmul.f32 0.5, %v2992_v34  ;;  %v1167_v60 = vmul.f32 %v2733_v1, %v2865_v15 }
 0x555   : > { %v2042_v19 = vpop.eup %2041  ;;  %v1664_v11 = vadd.f32 %v1648_v54, %v2824_v53  ;;  %v1260_v13 = vmul.f32 0.5, %v2040_v3  ;;  %2051 = vtanh.f32 %v1570_v26  ;;  %v3003_v37 = vadd.f32 %v2796_v59, %v2899_v33 }
 0x556   : > { %v1665_v36 = vadd.f32 %v1649_v55, %v2831_v4  ;;  %v1604_v63 = vmul.f32 0.5, %v2042_v19  ;;  %2053 = vtanh.f32 %v1571_v28  ;;  %v3007_v9 = vadd.f32 %v2757_v25, %v1167_v60 }
 0x557   : > { %v2044_v40 = vpop.eup %2043  ;;  %1680 = vst [vmem:[%s3009_s20] sm:$0xff] %v1664_v11  ;;  %v1276_v1 = vadd.f32 0.5, %v1260_v13  ;;  %v3014_v53 = vadd.f32 %v2796_v59, %v2906_v62  ;;  %v1398_v15 = vmul.f32 0.5, %v3003_v37  ;;  %v1510_v4 = vmul.f32 %v2763_v22, %v2884_v5  ;;  %v1534_v62 = vpop.permute.xlu1 %1533 }
 0x558   : > { %v2046_v33 = vpop.eup %2045  ;;  %1681 = vst [vmem:[%s3009_s20 + $0x8] sm:$0xff] %v1665_v36  ;;  %v1605_v25 = vmul.f32 0.5, %v2044_v40  ;;  %v1620_v21 = vadd.f32 0.5, %v1604_v63  ;;  %v1231_v16 = vmul.f32 0.5, %v3007_v9  ;;  %v1511_v47 = vmul.f32 %v2763_v22, %v2891_v18 }
 0x559   : > { %v1434_v7 = vmul.f32 0.5, %v2046_v33  ;;  %v3024_v10 = vmul.f32 %v1276_v1, %v2933_v38  ;;  %v1399_v59 = vmul.f32 0.5, %v3014_v53  ;;  %2055 = vtanh.f32 %v1398_v15 }
 0x55a   : > { %v1621_v50 = vadd.f32 0.5, %v1605_v25  ;;  %v1636_v45 = vmul.f32 %v1620_v21, %v2944_v27  ;;  %2057 = vtanh.f32 %v1231_v16  ;;  %v3028_v54 = vadd.f32 %v1534_v62, %v1510_v4 }
 0x55b   : > { %v1450_v26 = vadd.f32 0.5, %v1434_v7  ;;  %v3032_v3 = vmul.f32 %v2769_v32, %v3024_v10  ;;  %2059 = vtanh.f32 %v1399_v59  ;;  %v3034_v22 = vadd.f32 %v1534_v62, %v1511_v47  ;;  %v1542_v15 = vpop.permute.xlu1 %1541 }
 0x55c   : > { %v2048_v38 = vpop.eup %2047  ;;  %v1637_v55 = vmul.f32 %v1621_v50, %v2951_v51  ;;  %v1652_v28 = vadd.f32 %v1636_v45, %v1460_v42  ;;  %v1574_v60 = vmul.f32 0.5, %v3028_v54  ;;  %v3040_v27 = vadd.f32 %v2912_v44, %v2955_v29 }
 0x55d   : > { %v2050_v19 = vpop.eup %2049  ;;  %v3043_v11 = vmul.f32 %v1450_v26, %v2959_v8  ;;  %v1261_v13 = vmul.f32 0.5, %v2048_v38  ;;  %v1575_v36 = vmul.f32 0.5, %v3034_v22  ;;  %v1514_v63 = vmul.f32 %v2791_v56, %v2930_v41 }
 0x55e   : > { %v1653_v40 = vadd.f32 %v1637_v55, %v1461_v17  ;;  %v1668_v51 = vadd.f32 %v1652_v28, %v2877_v24  ;;  %v1262_v42 = vmul.f32 0.5, %v2050_v19  ;;  %2061 = vtanh.f32 %v1574_v60 }
 0x55f   : > { %v2052_v1 = vpop.eup %2051  ;;  %v1277_v44 = vadd.f32 0.5, %v1261_v13  ;;  %2063 = vtanh.f32 %v1575_v36  ;;  %v1403_v29 = vmul.f32 0.5, %v3040_v27  ;;  %v1515_v8 = vmul.f32 %v2791_v56, %v2942_v48 }
 0x560   : > { %v2054_v4 = vpop.eup %2053  ;;  %v1669_v33 = vadd.f32 %v1653_v40, %v2881_v43  ;;  %1684 = vst [vmem:[%s3009_s20 + $0x20] sm:$0xff] %v1668_v51  ;;  %v1278_v25 = vadd.f32 0.5, %v1262_v42  ;;  %v1602_v17 = vmul.f32 0.5, %v2052_v1  ;;  %v3054_v21 = vadd.f32 %v1542_v15, %v1514_v63  ;;  %v1550_v63 = vpop.permute.xlu1 %1549 }
 0x561   : > { %v3057_v24 = vmul.f32 %v1277_v44, %v2976_v23  ;;  %v1603_v16 = vmul.f32 0.5, %v2054_v4  ;;  %2065 = vtanh.f32 %v1403_v29  ;;  %v3059_v47 = vadd.f32 %v1542_v15, %v1515_v8 }
 0x562   : > { %1685 = vst [vmem:[%s3009_s20 + $0x28] sm:$0xff] %v1669_v33  ;;  %v3063_v7 = vmul.f32 %v1278_v25, %v2979_v52  ;;  %v1618_v56 = vadd.f32 0.5, %v1602_v17  ;;  %v1578_v59 = vmul.f32 0.5, %v3054_v21  ;;  %v3068_v43 = vadd.f32 %v2809_v49, %v2927_v39 }
 0x563   : > { %v2056_v62 = vpop.eup %2055  ;;  %v3072_v23 = vmul.f32 %v2769_v32, %v3057_v24  ;;  %v1619_v50 = vadd.f32 0.5, %v1603_v16  ;;  %v1579_v45 = vmul.f32 0.5, %v3059_v47  ;;  %v3077_v26 = vadd.f32 %v2809_v49, %v2939_v61 }
 0x564   : > { %v2058_v52 = vpop.eup %2057  ;;  %v1342_v38 = vmul.f32 %v2751_v20, %v3063_v7  ;;  %v1634_v55 = vmul.f32 %v1618_v56, %v2989_v12  ;;  %v1430_v39 = vmul.f32 0.5, %v2056_v62  ;;  %2067 = vtanh.f32 %v1578_v59 }
 0x565   : > { %v2060_v28 = vpop.eup %2059  ;;  %v1635_v60 = vmul.f32 %v1619_v50, %v2992_v34  ;;  %v1263_v32 = vmul.f32 0.5, %v2058_v52  ;;  %2069 = vtanh.f32 %v1579_v45  ;;  %v1518_v19 = vmul.f32 %v2806_v57, %v3063_v7 }
 0x566   : > { %v1650_v13 = vadd.f32 %v1634_v55, %v2968_v0  ;;  %v1431_v49 = vmul.f32 0.5, %v2060_v28  ;;  %v1446_v61 = vadd.f32 0.5, %v1430_v39  ;;  %v3087_v36 = vadd.f32 %v2948_v31, %v1342_v38 }
 0x567   : > { %v1651_v12 = vadd.f32 %v1635_v60, %v2973_v30  ;;  %v1279_v40 = vadd.f32 0.5, %v1263_v32  ;;  %v3090_v51 = vadd.f32 %v1550_v63, %v1518_v19  ;;  %v1400_v34 = vmul.f32 0.5, %v3068_v43 }
 0x568   : > { %v2062_v42 = vpop.eup %2061  ;;  %v1666_v1 = vadd.f32 %v1650_v13, %v2835_v35  ;;  %v1447_v44 = vadd.f32 0.5, %v1431_v49  ;;  %v1462_v0 = vmul.f32 %v1446_v61, %v3003_v37  ;;  %v1406_v29 = vmul.f32 0.5, %v3087_v36 }
 0x569   : > { %v2064_v8 = vpop.eup %2063  ;;  %v1667_v15 = vadd.f32 %v1651_v12, %v2843_v58  ;;  %v3098_v4 = vmul.f32 %v1279_v40, %v3007_v9  ;;  %v1606_v30 = vmul.f32 0.5, %v2062_v42  ;;  %v1582_v33 = vmul.f32 0.5, %v3090_v51  ;;  %v1538_v9 = vpop.permute.xlu0 %1537 }
 0x56a   : > { %1682 = vst [vmem:[%s3009_s20 + $0x10] sm:$0xff] %v1666_v1  ;;  %v1463_v25 = vmul.f32 %v1447_v44, %v3014_v53  ;;  %v1607_v17 = vmul.f32 0.5, %v2064_v8  ;;  %2071 = vtanh.f32 %v1406_v29  ;;  %v1401_v35 = vmul.f32 0.5, %v3077_v26  ;;  %v3256_v44 = vld [vmem:[#allocation12_spill] sm:$0xff] }
 0x56b   : > { %v2066_v16 = vpop.eup %2065  ;;  %1683 = vst [vmem:[%s3009_s20 + $0x18] sm:$0xff] %v1667_v15  ;;  %v1343_v37 = vmul.f32 %v2751_v20, %v3098_v4  ;;  %v1622_v56 = vadd.f32 0.5, %v1606_v30  ;;  %v1519_v58 = vmul.f32 %v2806_v57, %v3098_v4  ;;  %2073 = vtanh.f32 %v1582_v33 }
 0x56c   : > { %v1623_v59 = vadd.f32 0.5, %v1607_v17  ;;  %v1435_v62 = vmul.f32 0.5, %v2066_v16  ;;  %2075 = vtanh.f32 %v1400_v34  ;;  %v1512_v53 = vmul.f32 %v2767_v46, %v2916_v14 }
 0x56d   : > { %v1638_v50 = vmul.f32 %v1622_v56, %v3028_v54  ;;  %v3113_v45 = vadd.f32 %v2948_v31, %v1343_v37  ;;  %v3115_v52 = vadd.f32 %v1550_v63, %v1519_v58  ;;  %2077 = vtanh.f32 %v1401_v35  ;;  %v1546_v15 = vpop.permute.xlu0 %1545 }
 0x56e   : > { %v2068_v20 = vpop.eup %2067  ;;  %v1639_v38 = vmul.f32 %v1623_v59, %v3034_v22  ;;  %v1451_v57 = vadd.f32 0.5, %v1435_v62  ;;  %v1513_v55 = vmul.f32 %v2767_v46, %v2921_v6  ;;  %v3120_v39 = vadd.f32 %v1538_v9, %v1512_v53 }
 0x56f   : > { %v2070_v28 = vpop.eup %2069  ;;  %v1654_v60 = vadd.f32 %v1638_v50, %v1462_v0  ;;  %v1610_v32 = vmul.f32 0.5, %v2068_v20  ;;  %v1407_v54 = vmul.f32 0.5, %v3113_v45  ;;  %v1583_v31 = vmul.f32 0.5, %v3115_v52 }
 0x570   : > { %v1655_v19 = vadd.f32 %v1639_v38, %v1463_v25  ;;  %v1467_v13 = vmul.f32 %v1451_v57, %v3040_v27  ;;  %v1611_v49 = vmul.f32 0.5, %v2070_v28  ;;  %v3125_v22 = vadd.f32 %v1538_v9, %v1513_v55 }
 0x571   : > { %v1670_v61 = vadd.f32 %v1654_v60, %v2884_v5  ;;  %v1626_v46 = vadd.f32 0.5, %v1610_v32  ;;  %2079 = vtanh.f32 %v1407_v54  ;;  %v1576_v63 = vmul.f32 0.5, %v3120_v39 }
 0x572   : > { %v1671_v12 = vadd.f32 %v1655_v19, %v2891_v18  ;;  %v1627_v40 = vadd.f32 0.5, %v1611_v49  ;;  %2081 = vtanh.f32 %v1583_v31  ;;  %v1577_v34 = vmul.f32 0.5, %v3125_v22 }
 0x573   : > { %1686 = vst [vmem:[%s3009_s20 + $0x30] sm:$0xff] %v1670_v61  ;;  %v1642_v42 = vmul.f32 %v1626_v46, %v3054_v21  ;;  %2083 = vtanh.f32 %v1576_v63  ;;  %v3135_v27 = vadd.f32 %v2847_v2, %v3032_v3  ;;  %v3139_v5 = vadd.f32 %v2847_v2, %v3072_v23 }
 0x574   : > { %v2072_v1 = vpop.eup %2071  ;;  %1687 = vst [vmem:[%s3009_s20 + $0x38] sm:$0xff] %v1671_v12  ;;  %v1643_v18 = vmul.f32 %v1627_v40, %v3059_v47  ;;  %2085 = vtanh.f32 %v1577_v34  ;;  %v1516_v0 = vmul.f32 %v3256_v44, %v3024_v10  ;;  %v1517_v21 = vmul.f32 %v3256_v44, %v3057_v24 }
 0x575   : > { %v2074_v29 = vpop.eup %2073  ;;  %v1658_v8 = vadd.f32 %v1642_v42, %v3043_v11  ;;  %v1438_v3 = vmul.f32 0.5, %v2072_v1  ;;  %v1404_v2 = vmul.f32 0.5, %v3135_v27  ;;  %v1405_v23 = vmul.f32 0.5, %v3139_v5 }
 0x576   : > { %v2076_v30 = vpop.eup %2075  ;;  %v1659_v33 = vadd.f32 %v1643_v18, %v1467_v13  ;;  %v1614_v47 = vmul.f32 0.5, %v2074_v29  ;;  %v3150_v25 = vadd.f32 %v1546_v15, %v1516_v0  ;;  %v3152_v17 = vadd.f32 %v1546_v15, %v1517_v21 }
 0x577   : > { %v2078_v35 = vpop.eup %2077  ;;  %v1674_v16 = vadd.f32 %v1658_v8, %v2930_v41  ;;  %v1454_v37 = vadd.f32 0.5, %v1438_v3  ;;  %2087 = vtanh.f32 %v1404_v2  ;;  %v1432_v58 = vmul.f32 0.5, %v2076_v30 }
 0x578   : > { %v1675_v11 = vadd.f32 %v1659_v33, %v2942_v48  ;;  %v1630_v56 = vadd.f32 0.5, %v1614_v47  ;;  %2089 = vtanh.f32 %v1405_v23  ;;  %v1433_v59 = vmul.f32 0.5, %v2078_v35 }
 0x579   : > { %1690 = vst [vmem:[%s3009_s20 + $0x50] sm:$0xff] %v1674_v16  ;;  %v1470_v9 = vmul.f32 %v1454_v37, %v3087_v36  ;;  %v1580_v62 = vmul.f32 0.5, %v3150_v25  ;;  %v1581_v53 = vmul.f32 0.5, %v3152_v17  ;;  %v1448_v57 = vadd.f32 0.5, %v1432_v58 }
 0x57a   : > { %1691 = vst [vmem:[%s3009_s20 + $0x58] sm:$0xff] %v1675_v11  ;;  %v1646_v50 = vmul.f32 %v1630_v56, %v3090_v51  ;;  %v1449_v60 = vadd.f32 0.5, %v1433_v59 }
 0x57b   : > { %v2080_v20 = vpop.eup %2079  ;;  %2091 = vtanh.f32 %v1580_v62  ;;  %v1464_v49 = vmul.f32 %v1448_v57, %v3068_v43 }
 0x57c   : > { %v2082_v41 = vpop.eup %2081  ;;  %v1439_v38 = vmul.f32 0.5, %v2080_v20  ;;  %v1662_v48 = vadd.f32 %v1646_v50, %v1470_v9  ;;  %2093 = vtanh.f32 %v1581_v53  ;;  %v1465_v12 = vmul.f32 %v1449_v60, %v3077_v26 }
 0x57d   : > { %v2084_v55 = vpop.eup %2083  ;;  %v1615_v28 = vmul.f32 0.5, %v2082_v41 }
 0x57e   : > { %v2086_v36 = vpop.eup %2085  ;;  %v1455_v32 = vadd.f32 0.5, %v1439_v38  ;;  %v1678_v54 = vadd.f32 %v1662_v48, %v3063_v7  ;;  %v1608_v31 = vmul.f32 0.5, %v2084_v55 }
 0x57f   : > { %v1631_v19 = vadd.f32 0.5, %v1615_v28  ;;  %v1609_v13 = vmul.f32 0.5, %v2086_v36 }
 0x580   : > { %v1471_v51 = vmul.f32 %v1455_v32, %v3113_v45  ;;  %1694 = vst [vmem:[%s3009_s20 + $0x70] sm:$0xff] %v1678_v54  ;;  %v1624_v61 = vadd.f32 0.5, %v1608_v31 }
 0x581   : > { %v2088_v46 = vpop.eup %2087  ;;  %v1647_v63 = vmul.f32 %v1631_v19, %v3115_v52  ;;  %v1625_v40 = vadd.f32 0.5, %v1609_v13 }
 0x582   : > { %v2090_v34 = vpop.eup %2089  ;;  %v1640_v42 = vmul.f32 %v1624_v61, %v3120_v39  ;;  %v1436_v7 = vmul.f32 0.5, %v2088_v46 }
 0x583   : > { %v1663_v1 = vadd.f32 %v1647_v63, %v1471_v51  ;;  %v1641_v18 = vmul.f32 %v1625_v40, %v3125_v22  ;;  %v1437_v45 = vmul.f32 0.5, %v2090_v34 }
 0x584   : > { %v1656_v44 = vadd.f32 %v1640_v42, %v1464_v49  ;;  %v1452_v43 = vadd.f32 0.5, %v1436_v7 }
 0x585   : > { %v2092_v0 = vpop.eup %2091  ;;  %v1679_v21 = vadd.f32 %v1663_v1, %v3098_v4  ;;  %v1657_v52 = vadd.f32 %v1641_v18, %v1465_v12  ;;  %v1453_v26 = vadd.f32 0.5, %v1437_v45 }
 0x586   : > { %v2094_v29 = vpop.eup %2093  ;;  %v1672_v8 = vadd.f32 %v1656_v44, %v2916_v14  ;;  %v1612_v39 = vmul.f32 0.5, %v2092_v0  ;;  %v1468_v22 = vmul.f32 %v1452_v43, %v3135_v27 }
 0x587   : > { %1695 = vst [vmem:[%s3009_s20 + $0x78] sm:$0xff] %v1679_v21  ;;  %v1673_v3 = vadd.f32 %v1657_v52, %v2921_v6  ;;  %v1613_v15 = vmul.f32 0.5, %v2094_v29  ;;  %v1469_v4 = vmul.f32 %v1453_v26, %v3139_v5 }
 0x588   : > { %1688 = vst [vmem:[%s3009_s20 + $0x40] sm:$0xff] %v1672_v8  ;;  %v1628_v2 = vadd.f32 0.5, %v1612_v39 }
 0x589   : > { %1689 = vst [vmem:[%s3009_s20 + $0x48] sm:$0xff] %v1673_v3  ;;  %v1629_v23 = vadd.f32 0.5, %v1613_v15 }
 0x58a   : > { %v1644_v30 = vmul.f32 %v1628_v2, %v3150_v25 }
 0x58b   : > { %v1645_v14 = vmul.f32 %v1629_v23, %v3152_v17 }
 0x58c   : > { %v1660_v6 = vadd.f32 %v1644_v30, %v1468_v22 }
 0x58d   : > { %v1661_v33 = vadd.f32 %v1645_v14, %v1469_v4 }
 0x58e   : > { %v1676_v47 = vadd.f32 %v1660_v6, %v3024_v10 }
 0x58f   : > { %v1677_v27 = vadd.f32 %v1661_v33, %v3057_v24 }
 0x590   : > { %1692 = vst [vmem:[%s3009_s20 + $0x60] sm:$0xff] %v1676_v47 }
 0x591   : > { %1693 = vst [vmem:[%s3009_s20 + $0x68] sm:$0xff] %v1677_v27 }
 0x592   : > { %2166 = shalt.err (!%p2163_p7)
}
 0x593   : > { %s2167_s26 = scalar_lea.hbm %s3186_s29, 2048  ;;  %s2171_s9 = scalar_lea.hbm %s3239_s4, 4096 }
 0x594   : > { %p2168_p9 = scmp.ne.s32.totalorder %s3186_s29, %s2167_s26  ;;  %p2172_p0 = scmp.lt.u32.totalorder %s3186_s29, %s3239_s4 }
 0x595   : > { %p2173_p1 = scmp.lt.u32.totalorder %s2171_s9, %s2167_s26  ;;  %p2175_p4 = scmp.lt.u32.totalorder %s2167_s26, %s3186_s29 }
 0x596   : > { %p2169_p2 = pnand %p2168_p9, %p2373_p12 }
 0x597   : > { %p2174_p13 = por %p2173_p1, %p2172_p0 }
 0x598   : > { %p2170_p5 = pneg %p2169_p2 }
 0x599   : > { %p2176_p6 = por %p2175_p4, %p2174_p13 }
 0x59b   : > { %p2177_p8 = pnand %p2176_p6, %p2170_p5 }
 0x59d   : > { %2180 = shalt.err (!%p2177_p8)
}
 0x59e   : > { %s2255_s20 = smov 256   ;;  %s2256_s6 = smov 16  }
 0x59f   : > { %1839 = dma.vmem_to_hbm [thread:$0]  (%p2373_p12), %s3188_s5, 2048, %s3186_s29, %s1697_s19, %s2255_s20, %s2255_s20, %s2256_s6  }
 0x5a0 PF: > { %s1725_s7 = sand.u32 1, %s2211_s15   ;;  %p3257_p10 = scmp.ne.s32.totalorder %s3245_s22, 0 }
 0x5a1   : > { %p3258_p11 = scmp.ge.s32.totalorder %s2223_s18, 2  ;;  %s1726_s25 = scalar_lea.sflag [#allocation5], %s1725_s7 }
 0x5a3   : > { %p1850_p3 = pnand %p3258_p11, %p3257_p10 }
 0x5a5   : > { %2206 = dma.done.wait (!%p1850_p3), %s1726_s25, 2048  }
 0x5a6   : > { %2208 = vsyncadd (!%p1850_p3), %s1726_s25, 4294965248  ;;  %p18_p7 = scmp.ge.s32.totalorder %s2338_s27, 4   ;;  %s3259_s15 = smov %s2215_s16 }
 0x5a7   : > { %s3260_s16 = smov %s2219_s17  ;;  %s3261_s17 = smov %s2369_s24 }
 0x5a8   : > { %s3262_s18 = smov %s2338_s27  ;;  %20 = sbr.rel (!%p18_p7) target bundleno = 6 (0x6), region = 85 }
 0x5af   :  { %1731 = vsyncpa [#allocation4], 1 }
 0x5b0   :  { %1733 = vsyncpa [#allocation4 + $0x1], 1 }
 0x5b1   :  { %1734 = vsyncpa [#allocation7], 1 }
 0x5b2   :  { %1735 = vsyncpa [#allocation5], 1 }
 0x5b3   :  { %1737 = vsyncpa [#allocation5 + $0x1], 1 }

</bundles_post_ra>
